<compile_context>
chip_gen: v7x
topology: tpu7x:2x2x1
jax: 0.10.0
libtpu: 0.0.40
codegen_flags: <defaults>
</compile_context>

<pallas_src>
import jax
import jax.numpy as jnp
from jax import lax
from jax.experimental import pallas as pl
from jax.experimental.pallas import tpu as pltpu

MIN_NORM = 1e-15
BALL_EPS_F32 = 4e-3      # BALL_EPS[torch.float32] from the reference codebase
ARTANH_EPS = 1e-5


# ---------------- in-kernel math helpers: rank on sublanes, batch on lanes ----------------

def _rsum(x):
    """Sum over the rank (sublane) axis -> (1, T) column."""
    return jnp.sum(x, axis=0, keepdims=True)


def _expmap0_k(u, sqrt_c, inv_sqrt_c):
    # ||tanh(sc*|u|)/(sc*|u|) * u|| == tanh(sc*|u|)/sc, so the reference's proj() folds
    # into clamping tanh at (1 - eps): no second norm pass, no extra divide.
    u2 = _rsum(u * u)
    inv_un = lax.rsqrt(jnp.maximum(u2, MIN_NORM * MIN_NORM))       # (1, T)
    u_norm = u2 * inv_un
    t = jnp.tanh(sqrt_c * u_norm)
    scale = jnp.minimum(t, 1.0 - BALL_EPS_F32) * inv_un * inv_sqrt_c
    return u * scale


def _project_k(x, inv_sqrt_c):
    x2 = _rsum(x * x)                                              # (1, T)
    maxnorm = (1.0 - BALL_EPS_F32) * inv_sqrt_c
    scale = jnp.where(x2 > maxnorm * maxnorm,
                      maxnorm * lax.rsqrt(jnp.maximum(x2, MIN_NORM * MIN_NORM)),
                      1.0)
    return x * scale


def _mobius_add_k(x, y, c):
    x2 = _rsum(x * x)
    y2 = _rsum(y * y)
    xy = _rsum(x * y)
    denom = 1.0 + 2.0 * c * xy + c * c * x2 * y2
    inv = 1.0 / jnp.maximum(denom, MIN_NORM)       # exact column divide (holds 1e-4 check)
    a = (1.0 + 2.0 * c * xy + c * y2) * inv
    b = (1.0 - c * x2) * inv
    return a * x + b * y                           # broadcast multiplies


def _artanh(x):
    x = jnp.clip(x, -1.0 + ARTANH_EPS, 1.0 - ARTANH_EPS)
    return 0.5 * (jnp.log1p(x) - jnp.log1p(-x))


# ------------------------------------ Pallas kernel ------------------------------------

def rotx_kernel(head_ref, rel_ref, rel_diag_ref, rhs_ref,
                c_ref, lhsb_ref, rhsb_ref, out_ref):
    c = c_ref[...]                                                 # (1, T)
    sqrt_c = jnp.sqrt(c)
    inv_sqrt_c = 1.0 / sqrt_c

    # Blocks arrive batch-major (T, R).  One in-kernel XLU transpose per array puts the
    # batch on the 128-wide lane axis and the rank on sublanes: full VPU lane utilization
    # and a lane-dense (1, T) output, with no wrapper-side HBM rewrite.
    head_u = jnp.transpose(head_ref[...])                          # (R,  T)
    rel_t = jnp.transpose(rel_ref[...])                            # (2R, T)
    rd = jnp.transpose(rel_diag_ref[...])                          # (R,  T)
    v = jnp.transpose(rhs_ref[...])                                # (R,  T)
    R = head_u.shape[0]
    rel1_u, rel2_u = rel_t[:R], rel_t[R:]                          # 8-aligned sublane slices

    head = _expmap0_k(head_u, sqrt_c, inv_sqrt_c)
    rel1 = _expmap0_k(rel1_u, sqrt_c, inv_sqrt_c)
    rel2 = _expmap0_k(rel2_u, sqrt_c, inv_sqrt_c)

    lhs = _project_k(_mobius_add_k(head, rel1, c), inv_sqrt_c)

    # Givens rotations on the interleaved rank axis: the pair partner is the sublane
    # neighbour, fetched with two static sublane rolls (idle XLU) + a parity select.
    even = (lax.broadcasted_iota(jnp.int32, lhs.shape, 0) % 2) == 0
    rd_sw = jnp.where(even, pltpu.roll(rd, shift=R - 1, axis=0),
                      pltpu.roll(rd, shift=1, axis=0))
    x_sw = jnp.where(even, pltpu.roll(lhs, shift=R - 1, axis=0),
                     pltpu.roll(lhs, shift=1, axis=0))
    inv_gn = lax.rsqrt(jnp.maximum(rd * rd + rd_sw * rd_sw, MIN_NORM * MIN_NORM))
    gn = rd * inv_gn
    gn_sw = rd_sw * inv_gn
    res1 = jnp.where(even, gn, gn_sw) * lhs + jnp.where(even, -gn_sw, gn) * x_sw

    res2 = _mobius_add_k(res1, rel2, c)

    # hyp_distance_multi_c (training mode: per-row target).
    vnorm = jnp.sqrt(_rsum(v * v))                                 # no clamp (matches ref)
    xv = _rsum(res2 * v) / vnorm                                   # reduce first, 1 div/row
    gamma = jnp.tanh(sqrt_c * vnorm) * inv_sqrt_c
    x2 = _rsum(res2 * res2)
    c1 = 1.0 - 2.0 * c * gamma * xv + c * gamma * gamma
    c2 = 1.0 - c * x2
    num = jnp.sqrt(c1 * c1 * x2 + c2 * c2 * gamma * gamma - 2.0 * c1 * c2 * gamma * xv)
    denom = jnp.maximum(1.0 - 2.0 * c * gamma * xv + c * c * gamma * gamma * x2, MIN_NORM)
    dist = (2.0 * inv_sqrt_c) * _artanh(sqrt_c * num / denom)

    out_ref[...] = lhsb_ref[...] + rhsb_ref[...] - dist * dist     # bias == 'learn'


# ------------------------------------ JAX wrapper ------------------------------------

def rotx_forward(head, rel, rel_diag, rhs_e, lhs_biases, rhs_biases, c, *, tile_b=4096):
    """Training-mode forward (eval_mode=False, bias='learn'). Returns (B, 1) scores."""
    B, R = head.shape
    assert R % 2 == 0 and rel.shape == (B, 2 * R)

    # Tiny (1, B) scalar rows; contiguous reshapes only (no real HBM pass).
    c_row = jnp.reshape(c, (1, B))
    lhsb_row = jnp.reshape(lhs_biases, (1, B))
    rhsb_row = jnp.reshape(rhs_biases, (1, B))

    # Batch tiling: big lane tiles to amortize per-step pipeline overhead, but keep at
    # least 2 grid steps when the batch allows it (v7x dual-TC megacore sharding).
    tile_b = (max(128, min(int(tile_b), 8192)) // 128) * 128
    half_b = -(-pl.cdiv(B, 2) // 128) * 128          # ceil(B/2) rounded up to 128
    tile_b = max(128, min(tile_b, half_b))
    n_tiles = pl.cdiv(B, tile_b)                     # ragged last block; no padding pass

    mat_spec = pl.BlockSpec((tile_b, R), lambda i: (i, 0))
    rel_spec = pl.BlockSpec((tile_b, 2 * R), lambda i: (i, 0))
    col_spec = pl.BlockSpec((1, tile_b), lambda i: (0, i))

    out = pl.pallas_call(
        rotx_kernel,
        out_shape=jax.ShapeDtypeStruct((1, B), jnp.float32),
        grid=(n_tiles,),
        in_specs=[mat_spec, rel_spec, mat_spec, mat_spec,
                  col_spec, col_spec, col_spec],
        out_specs=col_spec,
        compiler_params=pltpu.CompilerParams(
            dimension_semantics=("parallel",),        # megacore / v7x dual-TC sharding
            vmem_limit_bytes=48 * 1024 * 1024,        # headroom even at tile_b=8192 / v7x
        ),
    )(head, rel, rel_diag, rhs_e, c_row, lhsb_row, rhsb_row)

    return jnp.reshape(out, (B, 1))


# --------------------------- pure-JAX reference (interleaved) ---------------------------

def _project_ref(x, sqrt_c):
    norm = jnp.maximum(jnp.sqrt(jnp.sum(x * x, axis=-1, keepdims=True)), MIN_NORM)
    maxnorm = (1.0 - BALL_EPS_F32) / sqrt_c
    projected = x / norm * maxnorm
    return jnp.where(norm > maxnorm, projected, x)


def _expmap0_ref(u, c, sqrt_c):
    u_norm = jnp.maximum(jnp.sqrt(jnp.sum(u * u, axis=-1, keepdims=True)), MIN_NORM)
    gamma_1 = jnp.tanh(sqrt_c * u_norm) * u / (sqrt_c * u_norm)
    return _project_ref(gamma_1, sqrt_c)


def _mobius_add_ref(x, y, c):
    x2 = jnp.sum(x * x, axis=-1, keepdims=True)
    y2 = jnp.sum(y * y, axis=-1, keepdims=True)
    xy = jnp.sum(x * y, axis=-1, keepdims=True)
    num = (1.0 + 2.0 * c * xy + c * y2) * x + (1.0 - c * x2) * y
    denom = 1.0 + 2.0 * c * xy + c * c * x2 * y2
    return num / jnp.maximum(denom, MIN_NORM)


def _givens_rotations_ref(r, x):
    B = r.shape[0]
    g = r.reshape(B, -1, 2)
    g = g / jnp.maximum(jnp.linalg.norm(g, axis=-1, keepdims=True), MIN_NORM)
    xp = x.reshape(B, -1, 2)
    x_rot = g[:, :, 0:1] * xp + g[:, :, 1:] * jnp.concatenate(
        [-xp[:, :, 1:], xp[:, :, 0:1]], axis=-1)
    return x_rot.reshape(B, -1)


def rotx_reference(head, rel, rel_diag, rhs_e, lhs_biases, rhs_biases, c):
    R = head.shape[1]
    sqrt_c = jnp.sqrt(c)
    rel1, rel2 = rel[:, :R], rel[:, R:]
    head_h = _expmap0_ref(head, c, sqrt_c)
    rel1_h = _expmap0_ref(rel1, c, sqrt_c)
    rel2_h = _expmap0_ref(rel2, c, sqrt_c)
    lhs = _project_ref(_mobius_add_ref(head_h, rel1_h, c), sqrt_c)
    res1 = _givens_rotations_ref(rel_diag, lhs)
    res2 = _mobius_add_ref(res1, rel2_h, c)

    vnorm = jnp.sqrt(jnp.sum(rhs_e * rhs_e, axis=-1, keepdims=True))
    xv = jnp.sum(res2 * rhs_e / vnorm, axis=-1, keepdims=True)
    gamma = jnp.tanh(sqrt_c * vnorm) / sqrt_c
    x2 = jnp.sum(res2 * res2, axis=-1, keepdims=True)
    c1 = 1.0 - 2.0 * c * gamma * xv + c * gamma * gamma
    c2 = 1.0 - c * x2
    num = jnp.sqrt(c1 * c1 * x2 + c2 * c2 * gamma * gamma - 2.0 * c1 * c2 * gamma * xv)
    denom = jnp.maximum(1.0 - 2.0 * c * gamma * xv + c * c * gamma * gamma * x2, MIN_NORM)
    dist = 2.0 * _artanh(sqrt_c * num / denom) / sqrt_c
    return lhs_biases + rhs_biases - dist * dist


# ---------------------------------------- main ----------------------------------------

if __name__ == "__main__":
    B, RANK = 300, 32          # exercises >=2 grid steps and a ragged last block
    key = jax.random.PRNGKey(0)
    k = jax.random.split(key, 8)

    init_size = 1e-3           # typical args.init_size scale in this codebase
    head = init_size * jax.random.normal(k[0], (B, RANK), jnp.float32)
    rel = init_size * jax.random.normal(k[1], (B, 2 * RANK), jnp.float32)
    rel_diag = 2.0 * jax.random.uniform(k[2], (B, RANK), jnp.float32) - 1.0
    rhs_e = init_size * jax.random.normal(k[3], (B, RANK), jnp.float32)
    lhs_biases = 0.01 * jax.random.normal(k[4], (B, 1), jnp.float32)
    rhs_biases = 0.01 * jax.random.normal(k[5], (B, 1), jnp.float32)
    # curvature c = softplus(trainable param), per query (multi_c gathers per relation)
    c = jax.nn.softplus(jax.random.normal(k[6], (B, 1), jnp.float32))

    fwd = jax.jit(rotx_forward, static_argnames=("tile_b",))
    out = jax.block_until_ready(fwd(head, rel, rel_diag, rhs_e,
                                    lhs_biases, rhs_biases, c))

    ref = rotx_reference(head, rel, rel_diag, rhs_e, lhs_biases, rhs_biases, c)
    assert out.shape == (B, 1)
    assert jnp.allclose(out, ref, rtol=1e-4, atol=1e-4), (out, ref)

    print("KERNEL_OK")
</pallas_src>

<mosaic_0001>
module attributes {stable_mosaic.version = 11 : i64} {
  func.func @rotx_kernel(%arg0: i32, %arg1: memref<256x32xf32, #tpu.memory_space<vmem>>, %arg2: memref<256x64xf32, #tpu.memory_space<vmem>>, %arg3: memref<256x32xf32, #tpu.memory_space<vmem>>, %arg4: memref<256x32xf32, #tpu.memory_space<vmem>>, %arg5: memref<1x256xf32, #tpu.memory_space<vmem>>, %arg6: memref<1x256xf32, #tpu.memory_space<vmem>>, %arg7: memref<1x256xf32, #tpu.memory_space<vmem>>, %arg8: memref<1x256xf32, #tpu.memory_space<vmem>>) attributes {dimension_semantics = [#tpu.dimension_semantics<parallel>], iteration_bounds = array<i64: 2>, scalar_prefetch = 0 : i64, scratch_operands = 0 : i64, tpu.core_type = #tpu.core_type<tc>, window_params = [{transform_indices = @transform_0, window_bounds = array<i64: 256, 32>}, {transform_indices = @transform_1, window_bounds = array<i64: 256, 64>}, {transform_indices = @transform_2, window_bounds = array<i64: 256, 32>}, {transform_indices = @transform_3, window_bounds = array<i64: 256, 32>}, {transform_indices = @transform_4, window_bounds = array<i64: 1, 256>}, {transform_indices = @transform_5, window_bounds = array<i64: 1, 256>}, {transform_indices = @transform_6, window_bounds = array<i64: 1, 256>}, {transform_indices = @transform_7, window_bounds = array<i64: 1, 256>}]} {
    %c0 = arith.constant 0 : index
    %c0_0 = arith.constant 0 : index
    %0 = vector.load %arg5[%c0, %c0_0] : memref<1x256xf32, #tpu.memory_space<vmem>>, vector<1x256xf32>
    %1 = math.sqrt %0 : vector<1x256xf32>
    %cst = arith.constant 1.000000e+00 : f32
    %2 = vector.broadcast %cst : f32 to vector<1x256xf32>
    %3 = arith.divf %2, %1 : vector<1x256xf32>
    %c0_1 = arith.constant 0 : index
    %c0_2 = arith.constant 0 : index
    %4 = vector.load %arg1[%c0_1, %c0_2] : memref<256x32xf32, #tpu.memory_space<vmem>>, vector<256x32xf32>
    %5 = tpu.transpose %4, [1, 0] : vector<256x32xf32> -> vector<32x256xf32>
    %c0_3 = arith.constant 0 : index
    %c0_4 = arith.constant 0 : index
    %6 = vector.load %arg2[%c0_3, %c0_4] : memref<256x64xf32, #tpu.memory_space<vmem>>, vector<256x64xf32>
    %7 = tpu.transpose %6, [1, 0] : vector<256x64xf32> -> vector<64x256xf32>
    %c0_5 = arith.constant 0 : index
    %c0_6 = arith.constant 0 : index
    %8 = vector.load %arg3[%c0_5, %c0_6] : memref<256x32xf32, #tpu.memory_space<vmem>>, vector<256x32xf32>
    %9 = tpu.transpose %8, [1, 0] : vector<256x32xf32> -> vector<32x256xf32>
    %c0_7 = arith.constant 0 : index
    %c0_8 = arith.constant 0 : index
    %10 = vector.load %arg4[%c0_7, %c0_8] : memref<256x32xf32, #tpu.memory_space<vmem>>, vector<256x32xf32>
    %11 = tpu.transpose %10, [1, 0] : vector<256x32xf32> -> vector<32x256xf32>
    %12 = vector.extract_strided_slice %7 {offsets = [0, 0], sizes = [32, 256], strides = [1, 1]} : vector<64x256xf32> to vector<32x256xf32>
    %13 = vector.extract_strided_slice %7 {offsets = [32, 0], sizes = [32, 256], strides = [1, 1]} : vector<64x256xf32> to vector<32x256xf32>
    %14 = arith.mulf %5, %5 : vector<32x256xf32>
    %cst_9 = arith.constant dense<0.000000e+00> : vector<256xf32>
    %15 = vector.multi_reduction <add>, %14, %cst_9 [0] : vector<32x256xf32> to vector<256xf32>
    %16 = vector.shape_cast %15 : vector<256xf32> to vector<1x256xf32>
    %cst_10 = arith.constant 1.000000e-30 : f32
    %17 = vector.broadcast %cst_10 : f32 to vector<1x256xf32>
    %18 = arith.maximumf %16, %17 : vector<1x256xf32>
    %19 = math.rsqrt %18 : vector<1x256xf32>
    %20 = arith.mulf %16, %19 : vector<1x256xf32>
    %21 = arith.mulf %1, %20 : vector<1x256xf32>
    %22 = math.tanh %21 : vector<1x256xf32>
    %cst_11 = arith.constant 0.995999991 : f32
    %23 = vector.broadcast %cst_11 : f32 to vector<1x256xf32>
    %24 = arith.minimumf %22, %23 : vector<1x256xf32>
    %25 = arith.mulf %24, %19 : vector<1x256xf32>
    %26 = arith.mulf %25, %3 : vector<1x256xf32>
    %27 = vector.broadcast %26 : vector<1x256xf32> to vector<32x256xf32>
    %28 = arith.mulf %5, %27 : vector<32x256xf32>
    %29 = arith.mulf %12, %12 : vector<32x256xf32>
    %cst_12 = arith.constant dense<0.000000e+00> : vector<256xf32>
    %30 = vector.multi_reduction <add>, %29, %cst_12 [0] : vector<32x256xf32> to vector<256xf32>
    %31 = vector.shape_cast %30 : vector<256xf32> to vector<1x256xf32>
    %cst_13 = arith.constant 1.000000e-30 : f32
    %32 = vector.broadcast %cst_13 : f32 to vector<1x256xf32>
    %33 = arith.maximumf %31, %32 : vector<1x256xf32>
    %34 = math.rsqrt %33 : vector<1x256xf32>
    %35 = arith.mulf %31, %34 : vector<1x256xf32>
    %36 = arith.mulf %1, %35 : vector<1x256xf32>
    %37 = math.tanh %36 : vector<1x256xf32>
    %cst_14 = arith.constant 0.995999991 : f32
    %38 = vector.broadcast %cst_14 : f32 to vector<1x256xf32>
    %39 = arith.minimumf %37, %38 : vector<1x256xf32>
    %40 = arith.mulf %39, %34 : vector<1x256xf32>
    %41 = arith.mulf %40, %3 : vector<1x256xf32>
    %42 = vector.broadcast %41 : vector<1x256xf32> to vector<32x256xf32>
    %43 = arith.mulf %12, %42 : vector<32x256xf32>
    %44 = arith.mulf %13, %13 : vector<32x256xf32>
    %cst_15 = arith.constant dense<0.000000e+00> : vector<256xf32>
    %45 = vector.multi_reduction <add>, %44, %cst_15 [0] : vector<32x256xf32> to vector<256xf32>
    %46 = vector.shape_cast %45 : vector<256xf32> to vector<1x256xf32>
    %cst_16 = arith.constant 1.000000e-30 : f32
    %47 = vector.broadcast %cst_16 : f32 to vector<1x256xf32>
    %48 = arith.maximumf %46, %47 : vector<1x256xf32>
    %49 = math.rsqrt %48 : vector<1x256xf32>
    %50 = arith.mulf %46, %49 : vector<1x256xf32>
    %51 = arith.mulf %1, %50 : vector<1x256xf32>
    %52 = math.tanh %51 : vector<1x256xf32>
    %cst_17 = arith.constant 0.995999991 : f32
    %53 = vector.broadcast %cst_17 : f32 to vector<1x256xf32>
    %54 = arith.minimumf %52, %53 : vector<1x256xf32>
    %55 = arith.mulf %54, %49 : vector<1x256xf32>
    %56 = arith.mulf %55, %3 : vector<1x256xf32>
    %57 = vector.broadcast %56 : vector<1x256xf32> to vector<32x256xf32>
    %58 = arith.mulf %13, %57 : vector<32x256xf32>
    %59 = arith.mulf %28, %28 : vector<32x256xf32>
    %cst_18 = arith.constant dense<0.000000e+00> : vector<256xf32>
    %60 = vector.multi_reduction <add>, %59, %cst_18 [0] : vector<32x256xf32> to vector<256xf32>
    %61 = vector.shape_cast %60 : vector<256xf32> to vector<1x256xf32>
    %62 = arith.mulf %43, %43 : vector<32x256xf32>
    %cst_19 = arith.constant dense<0.000000e+00> : vector<256xf32>
    %63 = vector.multi_reduction <add>, %62, %cst_19 [0] : vector<32x256xf32> to vector<256xf32>
    %64 = vector.shape_cast %63 : vector<256xf32> to vector<1x256xf32>
    %65 = arith.mulf %28, %43 : vector<32x256xf32>
    %cst_20 = arith.constant dense<0.000000e+00> : vector<256xf32>
    %66 = vector.multi_reduction <add>, %65, %cst_20 [0] : vector<32x256xf32> to vector<256xf32>
    %67 = vector.shape_cast %66 : vector<256xf32> to vector<1x256xf32>
    %cst_21 = arith.constant 2.000000e+00 : f32
    %68 = vector.broadcast %cst_21 : f32 to vector<1x256xf32>
    %69 = arith.mulf %68, %0 : vector<1x256xf32>
    %70 = arith.mulf %69, %67 : vector<1x256xf32>
    %cst_22 = arith.constant 1.000000e+00 : f32
    %71 = vector.broadcast %cst_22 : f32 to vector<1x256xf32>
    %72 = arith.addf %71, %70 : vector<1x256xf32>
    %73 = arith.mulf %0, %0 : vector<1x256xf32>
    %74 = arith.mulf %73, %61 : vector<1x256xf32>
    %75 = arith.mulf %74, %64 : vector<1x256xf32>
    %76 = arith.addf %72, %75 : vector<1x256xf32>
    %cst_23 = arith.constant 1.000000e-15 : f32
    %77 = vector.broadcast %cst_23 : f32 to vector<1x256xf32>
    %78 = arith.maximumf %76, %77 : vector<1x256xf32>
    %cst_24 = arith.constant 1.000000e+00 : f32
    %79 = vector.broadcast %cst_24 : f32 to vector<1x256xf32>
    %80 = arith.divf %79, %78 : vector<1x256xf32>
    %cst_25 = arith.constant 2.000000e+00 : f32
    %81 = vector.broadcast %cst_25 : f32 to vector<1x256xf32>
    %82 = arith.mulf %81, %0 : vector<1x256xf32>
    %83 = arith.mulf %82, %67 : vector<1x256xf32>
    %cst_26 = arith.constant 1.000000e+00 : f32
    %84 = vector.broadcast %cst_26 : f32 to vector<1x256xf32>
    %85 = arith.addf %84, %83 : vector<1x256xf32>
    %86 = arith.mulf %0, %64 : vector<1x256xf32>
    %87 = arith.addf %85, %86 : vector<1x256xf32>
    %88 = arith.mulf %87, %80 : vector<1x256xf32>
    %89 = arith.mulf %0, %61 : vector<1x256xf32>
    %cst_27 = arith.constant 1.000000e+00 : f32
    %90 = vector.broadcast %cst_27 : f32 to vector<1x256xf32>
    %91 = arith.subf %90, %89 : vector<1x256xf32>
    %92 = arith.mulf %91, %80 : vector<1x256xf32>
    %93 = vector.broadcast %88 : vector<1x256xf32> to vector<32x256xf32>
    %94 = arith.mulf %93, %28 : vector<32x256xf32>
    %95 = vector.broadcast %92 : vector<1x256xf32> to vector<32x256xf32>
    %96 = arith.mulf %95, %43 : vector<32x256xf32>
    %97 = arith.addf %94, %96 : vector<32x256xf32>
    %98 = arith.mulf %97, %97 : vector<32x256xf32>
    %cst_28 = arith.constant dense<0.000000e+00> : vector<256xf32>
    %99 = vector.multi_reduction <add>, %98, %cst_28 [0] : vector<32x256xf32> to vector<256xf32>
    %100 = vector.shape_cast %99 : vector<256xf32> to vector<1x256xf32>
    %cst_29 = arith.constant 0.995999991 : f32
    %101 = vector.broadcast %cst_29 : f32 to vector<1x256xf32>
    %102 = arith.mulf %101, %3 : vector<1x256xf32>
    %103 = arith.mulf %102, %102 : vector<1x256xf32>
    %104 = arith.cmpf ogt, %100, %103 : vector<1x256xf32>
    %cst_30 = arith.constant 1.000000e-30 : f32
    %105 = vector.broadcast %cst_30 : f32 to vector<1x256xf32>
    %106 = arith.maximumf %100, %105 : vector<1x256xf32>
    %107 = math.rsqrt %106 : vector<1x256xf32>
    %108 = arith.mulf %102, %107 : vector<1x256xf32>
    %cst_31 = arith.constant 1.000000e+00 : f32
    %109 = vector.broadcast %cst_31 : f32 to vector<1x256xf32>
    %110 = arith.select %104, %108, %109 : vector<1x256xi1>, vector<1x256xf32>
    %111 = vector.broadcast %110 : vector<1x256xf32> to vector<32x256xf32>
    %112 = arith.mulf %97, %111 : vector<32x256xf32>
    %113 = tpu.iota {dimensions = array<i32: 0>} : vector<32x256xi32>
    %c2_i32 = arith.constant 2 : i32
    %c0_i32 = arith.constant 0 : i32
    %114 = arith.cmpi eq, %c2_i32, %c0_i32 : i32
    %c1_i32 = arith.constant 1 : i32
    %115 = arith.select %114, %c1_i32, %c2_i32 : i32
    %116 = vector.broadcast %115 : i32 to vector<32x256xi32>
    %117 = arith.remsi %113, %116 : vector<32x256xi32>
    %c0_i32_32 = arith.constant 0 : i32
    %118 = vector.broadcast %c0_i32_32 : i32 to vector<32x256xi32>
    %119 = arith.cmpi ne, %117, %118 : vector<32x256xi32>
    %c0_i32_33 = arith.constant 0 : i32
    %120 = vector.broadcast %c0_i32_33 : i32 to vector<32x256xi32>
    %121 = arith.cmpi slt, %117, %120 : vector<32x256xi32>
    %c0_i32_34 = arith.constant 0 : i32
    %122 = arith.cmpi slt, %115, %c0_i32_34 : i32
    %123 = vector.broadcast %122 : i1 to vector<32x256xi1>
    %124 = vector.broadcast %123 : vector<32x256xi1> to vector<32x256xi1>
    %125 = arith.xori %121, %124 : vector<32x256xi1>
    %126 = arith.andi %125, %119 : vector<32x256xi1>
    %127 = vector.broadcast %115 : i32 to vector<32x256xi32>
    %128 = arith.addi %117, %127 : vector<32x256xi32>
    %129 = arith.select %126, %128, %117 : vector<32x256xi1>, vector<32x256xi32>
    %c0_i32_35 = arith.constant 0 : i32
    %130 = vector.broadcast %c0_i32_35 : i32 to vector<32x256xi32>
    %131 = arith.cmpi eq, %129, %130 : vector<32x256xi32>
    %c31_i32 = arith.constant 31 : i32
    %132 = tpu.dynamic_rotate %9 by %c31_i32 dim 0 : vector<32x256xf32>, i32 -> vector<32x256xf32>
    %c1_i32_36 = arith.constant 1 : i32
    %133 = tpu.dynamic_rotate %9 by %c1_i32_36 dim 0 : vector<32x256xf32>, i32 -> vector<32x256xf32>
    %134 = arith.select %131, %132, %133 : vector<32x256xi1>, vector<32x256xf32>
    %c31_i32_37 = arith.constant 31 : i32
    %135 = tpu.dynamic_rotate %112 by %c31_i32_37 dim 0 : vector<32x256xf32>, i32 -> vector<32x256xf32>
    %c1_i32_38 = arith.constant 1 : i32
    %136 = tpu.dynamic_rotate %112 by %c1_i32_38 dim 0 : vector<32x256xf32>, i32 -> vector<32x256xf32>
    %137 = arith.select %131, %135, %136 : vector<32x256xi1>, vector<32x256xf32>
    %138 = arith.mulf %9, %9 : vector<32x256xf32>
    %139 = arith.mulf %134, %134 : vector<32x256xf32>
    %140 = arith.addf %138, %139 : vector<32x256xf32>
    %cst_39 = arith.constant 1.000000e-30 : f32
    %141 = vector.broadcast %cst_39 : f32 to vector<32x256xf32>
    %142 = arith.maximumf %140, %141 : vector<32x256xf32>
    %143 = math.rsqrt %142 : vector<32x256xf32>
    %144 = arith.mulf %9, %143 : vector<32x256xf32>
    %145 = arith.mulf %134, %143 : vector<32x256xf32>
    %146 = arith.select %131, %144, %145 : vector<32x256xi1>, vector<32x256xf32>
    %147 = arith.mulf %146, %112 : vector<32x256xf32>
    %cst_40 = arith.constant 0.000000e+00 : f32
    %148 = vector.broadcast %cst_40 : f32 to vector<32x256xf32>
    %149 = arith.subf %148, %145 : vector<32x256xf32>
    %150 = arith.select %131, %149, %144 : vector<32x256xi1>, vector<32x256xf32>
    %151 = arith.mulf %150, %137 : vector<32x256xf32>
    %152 = arith.addf %147, %151 : vector<32x256xf32>
    %153 = arith.mulf %152, %152 : vector<32x256xf32>
    %cst_41 = arith.constant dense<0.000000e+00> : vector<256xf32>
    %154 = vector.multi_reduction <add>, %153, %cst_41 [0] : vector<32x256xf32> to vector<256xf32>
    %155 = vector.shape_cast %154 : vector<256xf32> to vector<1x256xf32>
    %156 = arith.mulf %58, %58 : vector<32x256xf32>
    %cst_42 = arith.constant dense<0.000000e+00> : vector<256xf32>
    %157 = vector.multi_reduction <add>, %156, %cst_42 [0] : vector<32x256xf32> to vector<256xf32>
    %158 = vector.shape_cast %157 : vector<256xf32> to vector<1x256xf32>
    %159 = arith.mulf %152, %58 : vector<32x256xf32>
    %cst_43 = arith.constant dense<0.000000e+00> : vector<256xf32>
    %160 = vector.multi_reduction <add>, %159, %cst_43 [0] : vector<32x256xf32> to vector<256xf32>
    %161 = vector.shape_cast %160 : vector<256xf32> to vector<1x256xf32>
    %cst_44 = arith.constant 2.000000e+00 : f32
    %162 = vector.broadcast %cst_44 : f32 to vector<1x256xf32>
    %163 = arith.mulf %162, %0 : vector<1x256xf32>
    %164 = arith.mulf %163, %161 : vector<1x256xf32>
    %cst_45 = arith.constant 1.000000e+00 : f32
    %165 = vector.broadcast %cst_45 : f32 to vector<1x256xf32>
    %166 = arith.addf %165, %164 : vector<1x256xf32>
    %167 = arith.mulf %0, %0 : vector<1x256xf32>
    %168 = arith.mulf %167, %155 : vector<1x256xf32>
    %169 = arith.mulf %168, %158 : vector<1x256xf32>
    %170 = arith.addf %166, %169 : vector<1x256xf32>
    %cst_46 = arith.constant 1.000000e-15 : f32
    %171 = vector.broadcast %cst_46 : f32 to vector<1x256xf32>
    %172 = arith.maximumf %170, %171 : vector<1x256xf32>
    %cst_47 = arith.constant 1.000000e+00 : f32
    %173 = vector.broadcast %cst_47 : f32 to vector<1x256xf32>
    %174 = arith.divf %173, %172 : vector<1x256xf32>
    %cst_48 = arith.constant 2.000000e+00 : f32
    %175 = vector.broadcast %cst_48 : f32 to vector<1x256xf32>
    %176 = arith.mulf %175, %0 : vector<1x256xf32>
    %177 = arith.mulf %176, %161 : vector<1x256xf32>
    %cst_49 = arith.constant 1.000000e+00 : f32
    %178 = vector.broadcast %cst_49 : f32 to vector<1x256xf32>
    %179 = arith.addf %178, %177 : vector<1x256xf32>
    %180 = arith.mulf %0, %158 : vector<1x256xf32>
    %181 = arith.addf %179, %180 : vector<1x256xf32>
    %182 = arith.mulf %181, %174 : vector<1x256xf32>
    %183 = arith.mulf %0, %155 : vector<1x256xf32>
    %cst_50 = arith.constant 1.000000e+00 : f32
    %184 = vector.broadcast %cst_50 : f32 to vector<1x256xf32>
    %185 = arith.subf %184, %183 : vector<1x256xf32>
    %186 = arith.mulf %185, %174 : vector<1x256xf32>
    %187 = vector.broadcast %182 : vector<1x256xf32> to vector<32x256xf32>
    %188 = arith.mulf %187, %152 : vector<32x256xf32>
    %189 = vector.broadcast %186 : vector<1x256xf32> to vector<32x256xf32>
    %190 = arith.mulf %189, %58 : vector<32x256xf32>
    %191 = arith.addf %188, %190 : vector<32x256xf32>
    %192 = arith.mulf %11, %11 : vector<32x256xf32>
    %cst_51 = arith.constant dense<0.000000e+00> : vector<256xf32>
    %193 = vector.multi_reduction <add>, %192, %cst_51 [0] : vector<32x256xf32> to vector<256xf32>
    %194 = vector.shape_cast %193 : vector<256xf32> to vector<1x256xf32>
    %195 = math.sqrt %194 : vector<1x256xf32>
    %196 = arith.mulf %191, %11 : vector<32x256xf32>
    %cst_52 = arith.constant dense<0.000000e+00> : vector<256xf32>
    %197 = vector.multi_reduction <add>, %196, %cst_52 [0] : vector<32x256xf32> to vector<256xf32>
    %198 = vector.shape_cast %197 : vector<256xf32> to vector<1x256xf32>
    %199 = arith.divf %198, %195 : vector<1x256xf32>
    %200 = arith.mulf %1, %195 : vector<1x256xf32>
    %201 = math.tanh %200 : vector<1x256xf32>
    %202 = arith.mulf %201, %3 : vector<1x256xf32>
    %203 = arith.mulf %191, %191 : vector<32x256xf32>
    %cst_53 = arith.constant dense<0.000000e+00> : vector<256xf32>
    %204 = vector.multi_reduction <add>, %203, %cst_53 [0] : vector<32x256xf32> to vector<256xf32>
    %205 = vector.shape_cast %204 : vector<256xf32> to vector<1x256xf32>
    %cst_54 = arith.constant 2.000000e+00 : f32
    %206 = vector.broadcast %cst_54 : f32 to vector<1x256xf32>
    %207 = arith.mulf %206, %0 : vector<1x256xf32>
    %208 = arith.mulf %207, %202 : vector<1x256xf32>
    %209 = arith.mulf %208, %199 : vector<1x256xf32>
    %cst_55 = arith.constant 1.000000e+00 : f32
    %210 = vector.broadcast %cst_55 : f32 to vector<1x256xf32>
    %211 = arith.subf %210, %209 : vector<1x256xf32>
    %212 = arith.mulf %0, %202 : vector<1x256xf32>
    %213 = arith.mulf %212, %202 : vector<1x256xf32>
    %214 = arith.addf %211, %213 : vector<1x256xf32>
    %215 = arith.mulf %0, %205 : vector<1x256xf32>
    %cst_56 = arith.constant 1.000000e+00 : f32
    %216 = vector.broadcast %cst_56 : f32 to vector<1x256xf32>
    %217 = arith.subf %216, %215 : vector<1x256xf32>
    %218 = arith.mulf %214, %214 : vector<1x256xf32>
    %219 = arith.mulf %218, %205 : vector<1x256xf32>
    %220 = arith.mulf %217, %217 : vector<1x256xf32>
    %221 = arith.mulf %220, %202 : vector<1x256xf32>
    %222 = arith.mulf %221, %202 : vector<1x256xf32>
    %223 = arith.addf %219, %222 : vector<1x256xf32>
    %cst_57 = arith.constant 2.000000e+00 : f32
    %224 = vector.broadcast %cst_57 : f32 to vector<1x256xf32>
    %225 = arith.mulf %224, %214 : vector<1x256xf32>
    %226 = arith.mulf %225, %217 : vector<1x256xf32>
    %227 = arith.mulf %226, %202 : vector<1x256xf32>
    %228 = arith.mulf %227, %199 : vector<1x256xf32>
    %229 = arith.subf %223, %228 : vector<1x256xf32>
    %230 = math.sqrt %229 : vector<1x256xf32>
    %cst_58 = arith.constant 2.000000e+00 : f32
    %231 = vector.broadcast %cst_58 : f32 to vector<1x256xf32>
    %232 = arith.mulf %231, %0 : vector<1x256xf32>
    %233 = arith.mulf %232, %202 : vector<1x256xf32>
    %234 = arith.mulf %233, %199 : vector<1x256xf32>
    %cst_59 = arith.constant 1.000000e+00 : f32
    %235 = vector.broadcast %cst_59 : f32 to vector<1x256xf32>
    %236 = arith.subf %235, %234 : vector<1x256xf32>
    %237 = arith.mulf %0, %0 : vector<1x256xf32>
    %238 = arith.mulf %237, %202 : vector<1x256xf32>
    %239 = arith.mulf %238, %202 : vector<1x256xf32>
    %240 = arith.mulf %239, %205 : vector<1x256xf32>
    %241 = arith.addf %236, %240 : vector<1x256xf32>
    %cst_60 = arith.constant 1.000000e-15 : f32
    %242 = vector.broadcast %cst_60 : f32 to vector<1x256xf32>
    %243 = arith.maximumf %241, %242 : vector<1x256xf32>
    %cst_61 = arith.constant 2.000000e+00 : f32
    %244 = vector.broadcast %cst_61 : f32 to vector<1x256xf32>
    %245 = arith.mulf %244, %3 : vector<1x256xf32>
    %246 = arith.mulf %1, %230 : vector<1x256xf32>
    %247 = arith.divf %246, %243 : vector<1x256xf32>
    %cst_62 = arith.constant -0.999989986 : f32
    %cst_63 = arith.constant 0.999989986 : f32
    %248 = vector.broadcast %cst_62 : f32 to vector<1x256xf32>
    %249 = arith.maximumf %248, %247 : vector<1x256xf32>
    %250 = vector.broadcast %cst_63 : f32 to vector<1x256xf32>
    %251 = arith.minimumf %250, %249 : vector<1x256xf32>
    %252 = math.log1p %251 : vector<1x256xf32>
    %cst_64 = arith.constant 0.000000e+00 : f32
    %253 = vector.broadcast %cst_64 : f32 to vector<1x256xf32>
    %254 = arith.subf %253, %251 : vector<1x256xf32>
    %255 = math.log1p %254 : vector<1x256xf32>
    %256 = arith.subf %252, %255 : vector<1x256xf32>
    %cst_65 = arith.constant 5.000000e-01 : f32
    %257 = vector.broadcast %cst_65 : f32 to vector<1x256xf32>
    %258 = arith.mulf %257, %256 : vector<1x256xf32>
    %259 = arith.mulf %245, %258 : vector<1x256xf32>
    %c0_66 = arith.constant 0 : index
    %c0_67 = arith.constant 0 : index
    %260 = vector.load %arg6[%c0_66, %c0_67] : memref<1x256xf32, #tpu.memory_space<vmem>>, vector<1x256xf32>
    %c0_68 = arith.constant 0 : index
    %c0_69 = arith.constant 0 : index
    %261 = vector.load %arg7[%c0_68, %c0_69] : memref<1x256xf32, #tpu.memory_space<vmem>>, vector<1x256xf32>
    %262 = arith.addf %260, %261 : vector<1x256xf32>
    %263 = arith.mulf %259, %259 : vector<1x256xf32>
    %264 = arith.subf %262, %263 : vector<1x256xf32>
    %c0_70 = arith.constant 0 : index
    %c0_71 = arith.constant 0 : index
    %265 = vector.load %arg8[%c0_70, %c0_71] : memref<1x256xf32, #tpu.memory_space<vmem>>, vector<1x256xf32>
    tpu.vector_store %arg8[%c0_70, %c0_71], %264 {strides = array<i32>} : memref<1x256xf32, #tpu.memory_space<vmem>>, vector<1x256xf32>,
    return
  }
  func.func @transform_0(%arg0: i32) -> (i32, i32) {
    %c0_i32 = arith.constant 0 : i32
    %c0_i32_0 = arith.constant 0 : i32
    return %arg0, %c0_i32 : i32, i32
  }
  func.func @transform_1(%arg0: i32) -> (i32, i32) {
    %c0_i32 = arith.constant 0 : i32
    %c0_i32_0 = arith.constant 0 : i32
    return %arg0, %c0_i32 : i32, i32
  }
  func.func @transform_2(%arg0: i32) -> (i32, i32) {
    %c0_i32 = arith.constant 0 : i32
    %c0_i32_0 = arith.constant 0 : i32
    return %arg0, %c0_i32 : i32, i32
  }
  func.func @transform_3(%arg0: i32) -> (i32, i32) {
    %c0_i32 = arith.constant 0 : i32
    %c0_i32_0 = arith.constant 0 : i32
    return %arg0, %c0_i32 : i32, i32
  }
  func.func @transform_4(%arg0: i32) -> (i32, i32) {
    %c0_i32 = arith.constant 0 : i32
    %c0_i32_0 = arith.constant 0 : i32
    return %c0_i32, %arg0 : i32, i32
  }
  func.func @transform_5(%arg0: i32) -> (i32, i32) {
    %c0_i32 = arith.constant 0 : i32
    %c0_i32_0 = arith.constant 0 : i32
    return %c0_i32, %arg0 : i32, i32
  }
  func.func @transform_6(%arg0: i32) -> (i32, i32) {
    %c0_i32 = arith.constant 0 : i32
    %c0_i32_0 = arith.constant 0 : i32
    return %c0_i32, %arg0 : i32, i32
  }
  func.func @transform_7(%arg0: i32) -> (i32, i32) {
    %c0_i32 = arith.constant 0 : i32
    %c0_i32_0 = arith.constant 0 : i32
    return %c0_i32, %arg0 : i32, i32
  }
}

</mosaic_0001>

<bundles_post_ra>
// kernel: rotx_forward.1
= control target key start
LH: loop header
LB: loop body
LE: loop exit
PB: predicated region body
PF: predicated region fallthrough
CT: control target
= control target key end

     0   :  { %12 = vsyncpa [#allocation3], 0  ;;  %s3806_s0 = inlined_call_operand.vmem [shape: f32[300,32], index: 0, kind: input, shape index: {}]   ;;  %s3807_s1 = inlined_call_operand.vmem [shape: f32[300,64], index: 1, kind: input, shape index: {}]   ;;  %s3808_s2 = inlined_call_operand.vmem [shape: f32[300,32], index: 2, kind: input, shape index: {}]   ;;  %s3809_s3 = inlined_call_operand.vmem [shape: f32[300,32], index: 3, kind: input, shape index: {}]   ;;  %s3810_s4 = inlined_call_operand.vmem [shape: f32[1,300], index: 4, kind: input, shape index: {}]   ;;  %s3811_s5 = inlined_call_operand.vmem [shape: f32[1,300], index: 5, kind: input, shape index: {}]   ;;  %s3812_s6 = inlined_call_operand.vmem [shape: f32[1,300], index: 6, kind: input, shape index: {}]   ;;  %s3813_s7 = inlined_call_operand.hbm [shape: f32[1,300], index: 7, kind: output, shape index: {}]  }
   0x1   :  { %14 = vsyncpa [#allocation3 + $0x1], 0  ;;  %s2538_s24 = smov 0   ;;  %s2540_s25 = smov 0  }
   0x2   :  { %s2542_s26 = smov 0   ;;  %s2544_s27 = smov 0  }
   0x3 LB: > { %s2559_s28 = sadd.s32 4294967295, %s2494_s27   ;;  %s2303_s29 = sadd.s32 4294967294, %s2494_s27   ;;  %s2494_s27 = sphi %s2544_s27, %s3944_s27   ;;  %s2490_s26 = sphi %s2542_s26, %s3943_s26   ;;  %s2486_s25 = sphi %s2540_s25, %s3942_s25   ;;  %s2482_s24 = sphi %s2538_s24, %s3941_s24  }
   0x4   : > { %s2563_s30 = sadd.s32 1, %s2494_s27   ;;  %s209_s8 = sadd.s32 1, %s2490_s26 }
   0x5   : > { %s206_s9 = ssub.s32 %s2494_s27, %s2563_s30  ;;  %p219_p0 = scmp.ne.s32.totalorder %s2490_s26, %s2486_s25 }
   0x6   : > { %p207_p1 = scmp.eq.s32.totalorder %s206_s9, 0  ;;  %p220_p2 = scmp.eq.s32.totalorder %s2559_s28, 1 }
   0x7   : > { %p225_p3 = scmp.ne.s32.totalorder %s2486_s25, %s2482_s24  ;;  %p226_p4 = scmp.eq.s32.totalorder %s2303_s29, 1 }
   0x8   : > { %s2574_s10 = scalar_select %p207_p1, %s2490_s26, %s209_s8  }
   0x9   : > { %p2576_p5 = por %p220_p2, %p219_p0  ;;  %p2580_p6 = por %p226_p4, %p225_p3 }
   0xa   : > { %p2306_p7 = scmp.ge.s32.totalorder %s2494_s27, 1  ;;  %p360_p8 = scmp.lt.s32.totalorder %s2494_s27, 3 }
   0xc   : > { %p361_p9 = pnand %p2306_p7, %p360_p8 }
   0xe   : > { %364 = sbr.rel (%p361_p9) target bundleno = 605 (0x25d), region = 48 }
  0x15   : > { %s2587_s13 = sshll.u32 %s2559_s28, 5  ;;  %s2708_s8 = sshll.u32 %s2559_s28, 1 }
  0x16   : > { %p452_p10 = scmp.lt.s32.totalorder %s2587_s13, 37  ;;  %p508_p11 = scmp.lt.s32.totalorder %s2708_s8, 2 }
  0x17   : > { %s2170_s17 = ssub.s32 (%p2576_p5), 3, %s2708_s8 }
  0x18   : > { %s453_s14 = scalar_select %p452_p10, %s2587_s13, 37 }
  0x19   : > { %s2724_s28 = scalar_select %p508_p11, %s2708_s8, 2 }
  0x1a   : > { %s2591_s15 = sshll.u32 %s453_s14, 3  ;;  %p2171_p12 = scmp.lt.s32.totalorder (%p2576_p5), %s2170_s17, 2 }
  0x1b   : > { %s2597_s18 = scalar_lea.vmem %s3806_s0, %s2591_s15  ;;  %s2635_s21 = scalar_lea.vmem %s3807_s1, %s2591_s15 }
  0x1c   : > { %v573_v0 = vld [vmem:[%s2597_s18 + $0x80] sm:$0xff]  ;;  %v574_v2 = vld [vmem:[%s2597_s18 + $0x88] sm:$0xff]  ;;  %v575_v4 = vld [vmem:[%s2597_s18 + $0x90] sm:$0xff]  ;;  %s2673_s29 = scalar_lea.vmem %s3808_s2, %s2591_s15  ;;  %s2732_s16 = scalar_lea.vmem %s3810_s4, %s2724_s28 }
  0x1d   : > { %v557_v1 = vld [vmem:[%s2597_s18] sm:$0xff]  ;;  %621 = vxpose.xlu1.b32.start [1/16] (narrow) %v573_v0, 32  ;;  %v558_v3 = vld [vmem:[%s2597_s18 + $0x8] sm:$0xff]  ;;  %v559_v5 = vld [vmem:[%s2597_s18 + $0x10] sm:$0xff]  ;;  %s2778_s19 = scalar_lea.vmem %s3809_s3, %s2591_s15  ;;  %s444_s15 = sand.u32 1, %s2486_s25  }
  0x1e   : > { %589 = vxpose.xlu0.b32.start [1/16] (narrow) %v557_v1, 32  ;;  %v576_v6 = vld [vmem:[%s2597_s18 + $0x98] sm:$0xff]  ;;  %v577_v8 = vld [vmem:[%s2597_s18 + $0xa0] sm:$0xff]  ;;  %v578_v10 = vld [vmem:[%s2597_s18 + $0xa8] sm:$0xff]  ;;  %s523_s22 = scalar_lea.vmem %s3811_s5, %s2724_s28  ;;  %s536_s9 = scalar_lea.vmem %s3812_s6, %s2724_s28 }
  0x1f   : > { %v560_v7 = vld [vmem:[%s2597_s18 + $0x18] sm:$0xff]  ;;  %v561_v9 = vld [vmem:[%s2597_s18 + $0x20] sm:$0xff]  ;;  %v562_v11 = vld [vmem:[%s2597_s18 + $0x28] sm:$0xff]  ;;  %s2307_s14 = sshll.u32 %s444_s15, 1 }
  0x20   : > { %v579_v12 = vld [vmem:[%s2597_s18 + $0xb0] sm:$0xff]  ;;  %v580_v14 = vld [vmem:[%s2597_s18 + $0xb8] sm:$0xff]  ;;  %v581_v16 = vld [vmem:[%s2597_s18 + $0xc0] sm:$0xff]  ;;  %s446_s28 = scalar_lea.vmem [#allocation2], %s2307_s14 }
  0x21   : > { %622 = vxpose.xlu1.b32.cont [2/16] (narrow) %v574_v2, 32  ;;  %v563_v13 = vld [vmem:[%s2597_s18 + $0x30] sm:$0xff]  ;;  %v564_v15 = vld [vmem:[%s2597_s18 + $0x38] sm:$0xff]  ;;  %v565_v17 = vld [vmem:[%s2597_s18 + $0x40] sm:$0xff] }
  0x22   : > { %590 = vxpose.xlu0.b32.cont [2/16] (narrow) %v558_v3, 32  ;;  %v582_v18 = vld [vmem:[%s2597_s18 + $0xc8] sm:$0xff]  ;;  %v583_v20 = vld [vmem:[%s2597_s18 + $0xd0] sm:$0xff]  ;;  %v584_v22 = vld [vmem:[%s2597_s18 + $0xd8] sm:$0xff] }
  0x23   : > { %v566_v19 = vld [vmem:[%s2597_s18 + $0x48] sm:$0xff]  ;;  %v567_v21 = vld [vmem:[%s2597_s18 + $0x50] sm:$0xff]  ;;  %v568_v23 = vld [vmem:[%s2597_s18 + $0x58] sm:$0xff] }
  0x24   : > { %v585_v24 = vld [vmem:[%s2597_s18 + $0xe0] sm:$0xff]  ;;  %v586_v26 = vld [vmem:[%s2597_s18 + $0xe8] sm:$0xff]  ;;  %v587_v28 = vld [vmem:[%s2597_s18 + $0xf0] sm:$0xff] }
  0x25   : > { %623 = vxpose.xlu1.b32.cont [3/16] (narrow) %v575_v4, 32  ;;  %v569_v25 = vld [vmem:[%s2597_s18 + $0x60] sm:$0xff]  ;;  %v570_v27 = vld [vmem:[%s2597_s18 + $0x68] sm:$0xff]  ;;  %v571_v29 = vld [vmem:[%s2597_s18 + $0x70] sm:$0xff] }
  0x26   : > { %591 = vxpose.xlu0.b32.cont [3/16] (narrow) %v559_v5, 32  ;;  %v588_v30 = vld [vmem:[%s2597_s18 + $0xf8] sm:$0xff]  ;;  %v669_v32 = vld [vmem:[%s2635_s21 + $0x80] sm:$0xff]  ;;  %v670_v34 = vld [vmem:[%s2635_s21 + $0x88] sm:$0xff] }
  0x27   : > { %v572_v31 = vld [vmem:[%s2597_s18 + $0x78] sm:$0xff]  ;;  %v653_v33 = vld [vmem:[%s2635_s21] sm:$0xff]  ;;  %v654_v35 = vld [vmem:[%s2635_s21 + $0x8] sm:$0xff] }
  0x28   : > { %v671_v36 = vld [vmem:[%s2635_s21 + $0x90] sm:$0xff]  ;;  %v672_v38 = vld [vmem:[%s2635_s21 + $0x98] sm:$0xff]  ;;  %v673_v40 = vld [vmem:[%s2635_s21 + $0xa0] sm:$0xff] }
  0x29   : > { %624 = vxpose.xlu1.b32.cont [4/16] (narrow) %v576_v6, 32  ;;  %v655_v37 = vld [vmem:[%s2635_s21 + $0x10] sm:$0xff]  ;;  %v656_v39 = vld [vmem:[%s2635_s21 + $0x18] sm:$0xff]  ;;  %v657_v41 = vld [vmem:[%s2635_s21 + $0x20] sm:$0xff] }
  0x2a   : > { %592 = vxpose.xlu0.b32.cont [4/16] (narrow) %v560_v7, 32  ;;  %v674_v42 = vld [vmem:[%s2635_s21 + $0xa8] sm:$0xff]  ;;  %v675_v44 = vld [vmem:[%s2635_s21 + $0xb0] sm:$0xff]  ;;  %v676_v46 = vld [vmem:[%s2635_s21 + $0xb8] sm:$0xff] }
  0x2b   : > { %v658_v43 = vld [vmem:[%s2635_s21 + $0x28] sm:$0xff]  ;;  %v659_v45 = vld [vmem:[%s2635_s21 + $0x30] sm:$0xff]  ;;  %v660_v47 = vld [vmem:[%s2635_s21 + $0x38] sm:$0xff] }
  0x2c   : > { %v677_v48 = vld [vmem:[%s2635_s21 + $0xc0] sm:$0xff]  ;;  %v678_v50 = vld [vmem:[%s2635_s21 + $0xc8] sm:$0xff]  ;;  %v679_v52 = vld [vmem:[%s2635_s21 + $0xd0] sm:$0xff] }
  0x2d   : > { %625 = vxpose.xlu1.b32.cont [5/16] (narrow) %v577_v8, 32  ;;  %v661_v49 = vld [vmem:[%s2635_s21 + $0x40] sm:$0xff]  ;;  %v662_v51 = vld [vmem:[%s2635_s21 + $0x48] sm:$0xff]  ;;  %v663_v53 = vld [vmem:[%s2635_s21 + $0x50] sm:$0xff] }
  0x2e   : > { %593 = vxpose.xlu0.b32.cont [5/16] (narrow) %v561_v9, 32  ;;  %v680_v54 = vld [vmem:[%s2635_s21 + $0xd8] sm:$0xff]  ;;  %v681_v56 = vld [vmem:[%s2635_s21 + $0xe0] sm:$0xff]  ;;  %v682_v58 = vld [vmem:[%s2635_s21 + $0xe8] sm:$0xff] }
  0x2f   : > { %v664_v55 = vld [vmem:[%s2635_s21 + $0x58] sm:$0xff]  ;;  %v665_v57 = vld [vmem:[%s2635_s21 + $0x60] sm:$0xff]  ;;  %v666_v59 = vld [vmem:[%s2635_s21 + $0x68] sm:$0xff] }
  0x30   : > { %v683_v60 = vld [vmem:[%s2635_s21 + $0xf0] sm:$0xff]  ;;  %v684_v62 = vld [vmem:[%s2635_s21 + $0xf8] sm:$0xff]  ;;  %v765_v0 = vld [vmem:[%s2673_s29 + $0x80] sm:$0xff] }
  0x31   : > { %626 = vxpose.xlu1.b32.cont [6/16] (narrow) %v578_v10, 32  ;;  %v667_v61 = vld [vmem:[%s2635_s21 + $0x70] sm:$0xff]  ;;  %v668_v63 = vld [vmem:[%s2635_s21 + $0x78] sm:$0xff]  ;;  %v749_v1 = vld [vmem:[%s2673_s29] sm:$0xff] }
  0x32   : > { %594 = vxpose.xlu0.b32.cont [6/16] (narrow) %v562_v11, 32  ;;  %v766_v4 = vld [vmem:[%s2673_s29 + $0x88] sm:$0xff] }
  0x33   : > { %v750_v5 = vld [vmem:[%s2673_s29 + $0x8] sm:$0xff] }
  0x35   : > { %627 = vxpose.xlu1.b32.cont [7/16] (narrow) %v579_v12, 32  ;;  %v767_v12 = vld [vmem:[%s2673_s29 + $0x90] sm:$0xff] }
  0x36   : > { %595 = vxpose.xlu0.b32.cont [7/16] (narrow) %v563_v13, 32  ;;  %v751_v13 = vld [vmem:[%s2673_s29 + $0x10] sm:$0xff] }
  0x39   : > { %628 = vxpose.xlu1.b32.cont [8/16] (narrow) %v580_v14, 32 }
  0x3a   : > { %596 = vxpose.xlu0.b32.cont [8/16] (narrow) %v564_v15, 32 }
  0x3d   : > { %629 = vxpose.xlu1.b32.cont [9/16] (narrow) %v581_v16, 32 }
  0x3e   : > { %597 = vxpose.xlu0.b32.cont [9/16] (narrow) %v565_v17, 32 }
  0x41   : > { %630 = vxpose.xlu1.b32.cont [10/16] (narrow) %v582_v18, 32 }
  0x42   : > { %598 = vxpose.xlu0.b32.cont [10/16] (narrow) %v566_v19, 32 }
  0x45   : > { %631 = vxpose.xlu1.b32.cont [11/16] (narrow) %v583_v20, 32  ;;  %v768_v20 = vld [vmem:[%s2673_s29 + $0x98] sm:$0xff] }
  0x46   : > { %599 = vxpose.xlu0.b32.cont [11/16] (narrow) %v567_v21, 32  ;;  %v752_v21 = vld [vmem:[%s2673_s29 + $0x18] sm:$0xff] }
  0x49   : > { %632 = vxpose.xlu1.b32.cont [12/16] (narrow) %v584_v22, 32 }
  0x4a   : > { %600 = vxpose.xlu0.b32.cont [12/16] (narrow) %v568_v23, 32 }
  0x4d   : > { %633 = vxpose.xlu1.b32.cont [13/16] (narrow) %v585_v24, 32 }
  0x4e   : > { %601 = vxpose.xlu0.b32.cont [13/16] (narrow) %v569_v25, 32 }
  0x51   : > { %634 = vxpose.xlu1.b32.cont [14/16] (narrow) %v586_v26, 32 }
  0x52   : > { %602 = vxpose.xlu0.b32.cont [14/16] (narrow) %v570_v27, 32 }
  0x55   : > { %635 = vxpose.xlu1.b32.cont [15/16] (narrow) %v587_v28, 32  ;;  %v769_v28 = vld [vmem:[%s2673_s29 + $0xa0] sm:$0xff] }
  0x56   : > { %603 = vxpose.xlu0.b32.cont [15/16] (narrow) %v571_v29, 32  ;;  %v753_v29 = vld [vmem:[%s2673_s29 + $0x20] sm:$0xff] }
  0x59   : > { %636 = vxpose.xlu1.b32.end [16/16] (narrow) %v588_v30, 32 }
  0x5a   : > { %604 = vxpose.xlu0.b32.end [16/16] (narrow) %v572_v31, 32 }
  0x5d   : > { %717 = vxpose.xlu1.b32.start [1/16] (narrow) %v669_v32, 64 }
  0x5e   : > { %685 = vxpose.xlu0.b32.start [1/16] (narrow) %v653_v33, 64 }
  0x61   : > { %718 = vxpose.xlu1.b32.cont [2/16] (narrow) %v670_v34, 64  ;;  %v770_v34 = vld [vmem:[%s2673_s29 + $0xa8] sm:$0xff] }
  0x62   : > { %686 = vxpose.xlu0.b32.cont [2/16] (narrow) %v654_v35, 64  ;;  %v754_v35 = vld [vmem:[%s2673_s29 + $0x28] sm:$0xff] }
  0x65   : > { %719 = vxpose.xlu1.b32.cont [3/16] (narrow) %v671_v36, 64 }
  0x66   : > { %687 = vxpose.xlu0.b32.cont [3/16] (narrow) %v655_v37, 64 }
  0x69   : > { %720 = vxpose.xlu1.b32.cont [4/16] (narrow) %v672_v38, 64 }
  0x6a   : > { %688 = vxpose.xlu0.b32.cont [4/16] (narrow) %v656_v39, 64 }
  0x6d   : > { %721 = vxpose.xlu1.b32.cont [5/16] (narrow) %v673_v40, 64  ;;  %v771_v40 = vld [vmem:[%s2673_s29 + $0xb0] sm:$0xff] }
  0x6e   : > { %689 = vxpose.xlu0.b32.cont [5/16] (narrow) %v657_v41, 64  ;;  %v755_v41 = vld [vmem:[%s2673_s29 + $0x30] sm:$0xff] }
  0x71   : > { %722 = vxpose.xlu1.b32.cont [6/16] (narrow) %v674_v42, 64 }
  0x72   : > { %690 = vxpose.xlu0.b32.cont [6/16] (narrow) %v658_v43, 64 }
  0x75   : > { %723 = vxpose.xlu1.b32.cont [7/16] (narrow) %v675_v44, 64 }
  0x76   : > { %691 = vxpose.xlu0.b32.cont [7/16] (narrow) %v659_v45, 64  ;;  %v2735_v45 = vld [vmem:[%s2732_s16] sm:$0x3] }
  0x77   : > { %2367 = vrsqrt.f32 %v2735_v45  ;;  %vm550_vm0 = vcmp.eq.f32.partialorder %v2735_v45, inf  ;;  %vm552_vm1 = vcmp.eq.f32.partialorder %v2735_v45, 0.0 }
  0x79   : > { %724 = vxpose.xlu1.b32.cont [8/16] (narrow) %v676_v46, 64 }
  0x7a   : > { %692 = vxpose.xlu0.b32.cont [8/16] (narrow) %v660_v47, 64  ;;  %v772_v47 = vld [vmem:[%s2673_s29 + $0xb8] sm:$0xff] }
  0x7d   : > { %725 = vxpose.xlu1.b32.cont [9/16] (narrow) %v677_v48, 64  ;;  %v756_v48 = vld [vmem:[%s2673_s29 + $0x38] sm:$0xff] }
  0x7e   : > { %693 = vxpose.xlu0.b32.cont [9/16] (narrow) %v661_v49, 64 }
  0x81   : > { %726 = vxpose.xlu1.b32.cont [10/16] (narrow) %v678_v50, 64 }
  0x82   : > { %694 = vxpose.xlu0.b32.cont [10/16] (narrow) %v662_v51, 64 }
  0x85   : > { %727 = vxpose.xlu1.b32.cont [11/16] (narrow) %v679_v52, 64 }
  0x86   : > { %695 = vxpose.xlu0.b32.cont [11/16] (narrow) %v663_v53, 64  ;;  %v773_v53 = vld [vmem:[%s2673_s29 + $0xc0] sm:$0xff] }
  0x89   : > { %728 = vxpose.xlu1.b32.cont [12/16] (narrow) %v680_v54, 64  ;;  %v757_v54 = vld [vmem:[%s2673_s29 + $0x40] sm:$0xff] }
  0x8a   : > { %696 = vxpose.xlu0.b32.cont [12/16] (narrow) %v664_v55, 64  ;;  %v774_v55 = vld [vmem:[%s2673_s29 + $0xc8] sm:$0xff] }
  0x8d   : > { %729 = vxpose.xlu1.b32.cont [13/16] (narrow) %v681_v56, 64  ;;  %v758_v56 = vld [vmem:[%s2673_s29 + $0x48] sm:$0xff] }
  0x8e   : > { %697 = vxpose.xlu0.b32.cont [13/16] (narrow) %v665_v57, 64  ;;  %v2496_v57 = vmov 1966171168  }
  0x91   : > { %730 = vxpose.xlu1.b32.cont [14/16] (narrow) %v682_v58, 64  ;;  %v977_v58 = vunpack.c.l.s4 %v2496_v57 }
  0x92   : > { %698 = vxpose.xlu0.b32.cont [14/16] (narrow) %v666_v59, 64  ;;  %v3814_v59 = vlaneseq }
  0x95   : > { %731 = vxpose.xlu1.b32.cont [15/16] (narrow) %v683_v60, 64  ;;  %v775_v60 = vld [vmem:[%s2673_s29 + $0xd0] sm:$0xff] }
  0x96   : > { %699 = vxpose.xlu0.b32.cont [15/16] (narrow) %v667_v61, 64  ;;  %v759_v61 = vld [vmem:[%s2673_s29 + $0x50] sm:$0xff] }
  0x99   : > { %732 = vxpose.xlu1.b32.end [16/16] (narrow) %v684_v62, 64  ;;  %v2368_v62 = vpop.eup %2367 }
  0x9a   : > { %700 = vxpose.xlu0.b32.end [16/16] (narrow) %v668_v63, 64  ;;  %v978_v63 = vunpack.c.0.s8 %v977_v58 }
  0x9d   : > { %v2677_v2 = vpop.trf.xlu1  ;;  %813 = vxpose.xlu1.b32.start [1/16] (narrow) %v765_v0, 32  ;;  %v2747_v0 = vshrl.u32 %v3814_v59, 7 }
  0x9e   : > { %v2679_v3 = vpop.trf.xlu0  ;;  %781 = vxpose.xlu0.b32.start [1/16] (narrow) %v749_v1, 32  ;;  %v942_v6 = vmul.f32 %v2677_v2, %v2677_v2 }
  0x9f   : > { %v941_v7 = vmul.f32 %v2679_v3, %v2679_v3  ;;  %vm1569_vm2 = vcmp.lt.s32.totalorder %v2747_v0, 7  ;;  %vm1586_vm3 = vcmp.lt.s32.totalorder %v2747_v0, 1 }
  0xa1   : > { %v2687_v8 = vpop.trf.xlu1  ;;  %814 = vxpose.xlu1.b32.cont [2/16] (narrow) %v766_v4, 32  ;;  %v549_v4 = vmul.f32 %v2368_v62, %v2735_v45 }
  0xa2   : > { %v2689_v9 = vpop.trf.xlu0  ;;  %782 = vxpose.xlu0.b32.cont [2/16] (narrow) %v750_v5, 32  ;;  %v944_v10 = vmul.f32 %v2687_v8, %v2687_v8  ;;  %v776_v5 = vld [vmem:[%s2673_s29 + $0xd8] sm:$0xff] }
  0xa3   : > { %v943_v11 = vmul.f32 %v2689_v9, %v2689_v9 }
  0xa4   : > { %v958_v14 = vadd.f32 %v944_v10, %v942_v6  ;;  %v760_v6 = vld [vmem:[%s2673_s29 + $0x58] sm:$0xff] }
  0xa5   : > { %v949_v15 = vadd.f32 %v943_v11, %v941_v7  ;;  %v2697_v16 = vpop.trf.xlu1  ;;  %815 = vxpose.xlu1.b32.cont [3/16] (narrow) %v767_v12, 32  ;;  %v2754_v11 = vsub.s32 %v978_v63, %v2747_v0 }
  0xa6   : > { %v2699_v17 = vpop.trf.xlu0  ;;  %783 = vxpose.xlu0.b32.cont [3/16] (narrow) %v751_v13, 32  ;;  %v946_v18 = vmul.f32 %v2697_v16, %v2697_v16  ;;  %v553_v13 = vand.u32 2147483648, %v2735_v45 }
  0xa7   : > { %v945_v19 = vmul.f32 %v2699_v17, %v2699_v17  ;;  %3864 = vst [vmem:[#allocation5_spill] sm:$0xff] %v2754_v11 }
  0xa8   : > { %v959_v22 = vadd.f32 %v958_v14, %v946_v18  ;;  %v551_v14 = vsel %vm550_vm0, %v2735_v45, %v549_v4  ;;  %v777_v18 = vld [vmem:[%s2673_s29 + $0xe0] sm:$0xff] }
  0xa9   : > { %v950_v23 = vadd.f32 %v949_v15, %v945_v19  ;;  %v2710_v24 = vpop.trf.xlu1  ;;  %816 = vxpose.xlu1.b32.cont [4/16] (narrow) %v768_v20, 32  ;;  %v761_v19 = vld [vmem:[%s2673_s29 + $0x60] sm:$0xff] }
  0xaa   : > { %v2712_v25 = vpop.trf.xlu0  ;;  %784 = vxpose.xlu0.b32.cont [4/16] (narrow) %v752_v21, 32  ;;  %v948_v26 = vmul.f32 %v2710_v24, %v2710_v24  ;;  %v2762_v21 = vsel %vm552_vm1, %v553_v13, %v551_v14 }
  0xab   : > { %v947_v27 = vmul.f32 %v2712_v25, %v2712_v25  ;;  %3865 = vst [vmem:[#allocation6_spill] sm:$0xff] %v2762_v21 }
  0xac   : > { %v960_v30 = vadd.f32 %v959_v22, %v948_v26  ;;  %v762_v26 = vld [vmem:[%s2673_s29 + $0x68] sm:$0xff] }
  0xad   : > { %v951_v31 = vadd.f32 %v950_v23, %v947_v27  ;;  %817 = vxpose.xlu1.b32.cont [5/16] (narrow) %v769_v28, 32  ;;  %v778_v23 = vld [vmem:[%s2673_s29 + $0xe8] sm:$0xff]  ;;  %v779_v28 = vld [vmem:[%s2673_s29 + $0xf0] sm:$0xff] }
  0xae   : > { %785 = vxpose.xlu0.b32.cont [5/16] (narrow) %v753_v29, 32  ;;  %v961_v32 = vrot.slane %v960_v30, 4  ;;  %v763_v29 = vld [vmem:[%s2673_s29 + $0x70] sm:$0xff] }
  0xaf   : > { %v952_v33 = vrot.slane %v951_v31, 4 }
  0xb0   : > { %v962_v36 = vadd.f32 %v961_v32, %v960_v30  ;;  %v764_v32 = vld [vmem:[%s2673_s29 + $0x78] sm:$0xff] }
  0xb1   : > { %v953_v37 = vadd.f32 %v952_v33, %v951_v31  ;;  %818 = vxpose.xlu1.b32.cont [6/16] (narrow) %v770_v34, 32  ;;  %v780_v31 = vld [vmem:[%s2673_s29 + $0xf8] sm:$0xff]  ;;  %v861_v34 = vld [vmem:[%s2778_s19 + $0x80] sm:$0xff] }
  0xb2   : > { %786 = vxpose.xlu0.b32.cont [6/16] (narrow) %v754_v35, 32  ;;  %v963_v38 = vrot.slane %v962_v36, 2  ;;  %v845_v35 = vld [vmem:[%s2778_s19] sm:$0xff] }
  0xb3   : > { %v954_v39 = vrot.slane %v953_v37, 2 }
  0xb4   : > { %v964_v42 = vadd.f32 %v963_v38, %v962_v36 }
  0xb5   : > { %v955_v43 = vadd.f32 %v954_v39, %v953_v37  ;;  %819 = vxpose.xlu1.b32.cont [7/16] (narrow) %v771_v40, 32 }
  0xb6   : > { %787 = vxpose.xlu0.b32.cont [7/16] (narrow) %v755_v41, 32  ;;  %v965_v44 = vrot.slane %v964_v42, 1 }
  0xb7   : > { %v956_v46 = vrot.slane %v955_v43, 1 }
  0xb8   : > { %v966_v49 = vadd.f32 %v965_v44, %v964_v42  ;;  %v862_v42 = vld [vmem:[%s2778_s19 + $0x88] sm:$0xff]  ;;  %v2792_v44 = vsub.s32 0, %v2747_v0 }
  0xb9   : > { %v957_v50 = vadd.f32 %v956_v46, %v955_v43  ;;  %820 = vxpose.xlu1.b32.cont [8/16] (narrow) %v772_v47, 32  ;;  %v846_v43 = vld [vmem:[%s2778_s19 + $0x8] sm:$0xff]  ;;  %v2795_v46 = vsub.s32 1, %v2747_v0 }
  0xba   : > { %788 = vxpose.xlu0.b32.cont [8/16] (narrow) %v756_v48, 32  ;;  %v968_v51 = vmax.f32 %v966_v49, 1e-30  ;;  %3867 = vst [vmem:[#allocation8_spill] sm:$0xff] %v2792_v44 }
  0xbb   : > { %v967_v52 = vmax.f32 %v957_v50, 1e-30  ;;  %3868 = vst [vmem:[#allocation9_spill] sm:$0xff] %v2795_v46 }
  0xbc   : > { %2369 = vrsqrt.f32 %v968_v51  ;;  %v863_v51 = vld [vmem:[%s2778_s19 + $0x90] sm:$0xff] }
  0xbd   : > { %2371 = vrsqrt.f32 %v967_v52  ;;  %821 = vxpose.xlu1.b32.cont [9/16] (narrow) %v773_v53, 32 }
  0xbe   : > { %789 = vxpose.xlu0.b32.cont [9/16] (narrow) %v757_v54, 32  ;;  %v847_v54 = vld [vmem:[%s2778_s19 + $0x10] sm:$0xff] }
  0xc1   : > { %822 = vxpose.xlu1.b32.cont [10/16] (narrow) %v774_v55, 32 }
  0xc2   : > { %790 = vxpose.xlu0.b32.cont [10/16] (narrow) %v758_v56, 32 }
  0xc5   : > { %823 = vxpose.xlu1.b32.cont [11/16] (narrow) %v775_v60, 32 }
  0xc6   : > { %791 = vxpose.xlu0.b32.cont [11/16] (narrow) %v759_v61, 32  ;;  %v2370_v1 = vpop.eup %2369 }
  0xc7   : > { %v2372_v7 = vpop.eup %2371  ;;  %v972_v10 = vmul.f32 %v2370_v1, %v966_v49 }
  0xc8   : > { %v971_v12 = vmul.f32 %v2372_v7, %v957_v50  ;;  %v996_v30 = vcombine.low %v2372_v7, %v2370_v1 }
  0xc9   : > { %824 = vxpose.xlu1.b32.cont [12/16] (narrow) %v776_v5, 32 }
  0xca   : > { %792 = vxpose.xlu0.b32.cont [12/16] (narrow) %v760_v6, 32  ;;  %v975_v15 = vcombine.low %v971_v12, %v972_v10  ;;  %v1003_v33 = vrot.slane %v996_v30, %v2754_v11  ;;  %v848_v10 = vld [vmem:[%s2778_s19 + $0x18] sm:$0xff] }
  0xcc   : > { %v982_v20 = vrot.slane %v975_v15, %v2754_v11  ;;  %v1010_v36 = vrot.slane %v1003_v33, %v2754_v11 }
  0xcd   : > { %825 = vxpose.xlu1.b32.cont [13/16] (narrow) %v777_v18, 32 }
  0xce   : > { %793 = vxpose.xlu0.b32.cont [13/16] (narrow) %v761_v19, 32  ;;  %v989_v22 = vrot.slane %v982_v20, %v2754_v11 }
  0xd0   : > { %v991_v27 = vmul.f32 %v989_v22, %v2762_v21 }
  0xd1   : > { %826 = vxpose.xlu1.b32.cont [14/16] (narrow) %v778_v23, 32 }
  0xd2   : > { %794 = vxpose.xlu0.b32.cont [14/16] (narrow) %v762_v26, 32  ;;  %2373 = vtanh.f32 %v991_v27 }
  0xd3   : > { %2375 = vrcp.f32 %v2762_v21 }
  0xd5   : > { %827 = vxpose.xlu1.b32.cont [15/16] (narrow) %v779_v28, 32 }
  0xd6   : > { %795 = vxpose.xlu0.b32.cont [15/16] (narrow) %v763_v29, 32  ;;  %v865_v29 = vld [vmem:[%s2778_s19 + $0xa0] sm:$0xff] }
  0xd9   : > { %828 = vxpose.xlu1.b32.end [16/16] (narrow) %v780_v31, 32 }
  0xda   : > { %796 = vxpose.xlu0.b32.end [16/16] (narrow) %v764_v32, 32 }
  0xdc   : > { %v2374_v37 = vpop.eup %2373 }
  0xdd   : > { %v993_v38 = vmin.f32 %v2374_v37, 0.996  ;;  %v2783_v39 = vpop.trf.xlu1  ;;  %909 = vxpose.xlu1.b32.start [1/16] (narrow) %v861_v34, 32  ;;  %v2787_v41 = vpop.eup %2375  ;;  %v849_v34 = vld [vmem:[%s2778_s19 + $0x20] sm:$0xff] }
  0xde   : > { %v2785_v40 = vpop.trf.xlu0  ;;  %877 = vxpose.xlu0.b32.start [1/16] (narrow) %v845_v35, 32  ;;  %3866 = vst [vmem:[#allocation7_spill] sm:$0xff] %v2787_v41  ;;  %v1034_v55 = vmul.f32 %v2783_v39, %v2783_v39 }
  0xdf   : > { %v1012_v47 = vmul.f32 %v1010_v36, %v993_v38  ;;  %v1033_v56 = vmul.f32 %v2785_v40, %v2785_v40 }
  0xe1   : > { %v1013_v48 = vmul.f32 %v2787_v41, %v1012_v47  ;;  %v2798_v49 = vpop.trf.xlu1  ;;  %910 = vxpose.xlu1.b32.cont [2/16] (narrow) %v862_v42, 32  ;;  %v866_v47 = vld [vmem:[%s2778_s19 + $0xa8] sm:$0xff] }
  0xe2   : > { %v2800_v50 = vpop.trf.xlu0  ;;  %878 = vxpose.xlu0.b32.cont [2/16] (narrow) %v846_v43, 32  ;;  %v1036_v57 = vmul.f32 %v2798_v49, %v2798_v49 }
  0xe3   : > { %v1018_v52 = vrot.slane %v1013_v48, %v2792_v44  ;;  %v1022_v53 = vrot.slane %v1013_v48, %v2795_v46  ;;  %v1035_v58 = vmul.f32 %v2800_v50, %v2800_v50 }
  0xe4   : > { %v1050_v12 = vadd.f32 %v1036_v57, %v1034_v55 }
  0xe5   : > { %v2815_v60 = vmul.f32 %v1018_v52, %v2679_v3  ;;  %v2818_v61 = vmul.f32 %v1022_v53, %v2677_v2  ;;  %v2821_v62 = vmul.f32 %v1018_v52, %v2689_v9  ;;  %v2824_v63 = vmul.f32 %v1022_v53, %v2687_v8  ;;  %v2826_v1 = vpop.trf.xlu1  ;;  %911 = vxpose.xlu1.b32.cont [3/16] (narrow) %v863_v51, 32  ;;  %v864_v8 = vld [vmem:[%s2778_s19 + $0x98] sm:$0xff] }
  0xe6   : > { %v2828_v4 = vpop.trf.xlu0  ;;  %v2831_v5 = vmul.f32 %v1018_v52, %v2699_v17  ;;  %v2834_v3 = vmul.f32 %v1022_v53, %v2697_v16  ;;  %v2837_v2 = vmul.f32 %v1018_v52, %v2712_v25  ;;  %v2840_v9 = vmul.f32 %v1022_v53, %v2710_v24  ;;  %879 = vxpose.xlu0.b32.cont [3/16] (narrow) %v847_v54, 32  ;;  %v850_v54 = vld [vmem:[%s2778_s19 + $0x28] sm:$0xff] }
  0xe7   : > { %v1217_v6 = vmul.f32 %v2815_v60, %v2815_v60  ;;  %v1218_v7 = vmul.f32 %v2818_v61, %v2818_v61  ;;  %v1219_v17 = vmul.f32 %v2821_v62, %v2821_v62  ;;  %v1220_v16 = vmul.f32 %v2824_v63, %v2824_v63 }
  0xe8   : > { %v1221_v25 = vmul.f32 %v2831_v5, %v2831_v5  ;;  %v1222_v24 = vmul.f32 %v2834_v3, %v2834_v3  ;;  %v1041_v13 = vadd.f32 %v1035_v58, %v1033_v56  ;;  %v1038_v18 = vmul.f32 %v2826_v1, %v2826_v1 }
  0xe9   : > { %v1225_v14 = vadd.f32 %v1219_v17, %v1217_v6  ;;  %v1234_v15 = vadd.f32 %v1220_v16, %v1218_v7  ;;  %v1037_v19 = vmul.f32 %v2828_v4, %v2828_v4  ;;  %v2860_v20 = vpop.trf.xlu1  ;;  %912 = vxpose.xlu1.b32.cont [4/16] (narrow) %v864_v8, 32  ;;  %v1223_v23 = vmul.f32 %v2837_v2, %v2837_v2 }
  0xea   : > { %v2862_v22 = vpop.trf.xlu0  ;;  %v1224_v26 = vmul.f32 %v2840_v9, %v2840_v9  ;;  %v1040_v27 = vmul.f32 %v2860_v20, %v2860_v20  ;;  %880 = vxpose.xlu0.b32.cont [4/16] (narrow) %v848_v10, 32  ;;  %v1051_v32 = vadd.f32 %v1050_v12, %v1038_v18 }
  0xeb   : > { %v1039_v28 = vmul.f32 %v2862_v22, %v2862_v22  ;;  %v1226_v30 = vadd.f32 %v1225_v14, %v1221_v25  ;;  %v1235_v31 = vadd.f32 %v1234_v15, %v1222_v24  ;;  %v1042_v33 = vadd.f32 %v1041_v13, %v1037_v19  ;;  %v867_v25 = vld [vmem:[%s2778_s19 + $0xb0] sm:$0xff] }
  0xec   : > { %v1052_v37 = vadd.f32 %v1051_v32, %v1040_v27  ;;  %v851_v15 = vld [vmem:[%s2778_s19 + $0x30] sm:$0xff] }
  0xed   : > { %v1227_v35 = vadd.f32 %v1226_v30, %v1223_v23  ;;  %v1236_v36 = vadd.f32 %v1235_v31, %v1224_v26  ;;  %v1043_v38 = vadd.f32 %v1042_v33, %v1039_v28  ;;  %v2874_v42 = vpop.trf.xlu1  ;;  %913 = vxpose.xlu1.b32.cont [5/16] (narrow) %v865_v29, 32  ;;  %v868_v33 = vld [vmem:[%s2778_s19 + $0xb8] sm:$0xff] }
  0xee   : > { %v2876_v43 = vpop.trf.xlu0  ;;  %881 = vxpose.xlu0.b32.cont [5/16] (narrow) %v849_v34, 32  ;;  %v1053_v52 = vrot.slane %v1052_v37, 4  ;;  %v1126_v55 = vmul.f32 %v2874_v42, %v2874_v42 }
  0xef   : > { %v1228_v48 = vrot.slane %v1227_v35, 4  ;;  %v1237_v51 = vrot.slane %v1236_v36, 4  ;;  %v1044_v53 = vrot.slane %v1043_v38, 4  ;;  %v1125_v56 = vmul.f32 %v2876_v43, %v2876_v43 }
  0xf0   : > { %v1054_v8 = vadd.f32 %v1053_v52, %v1052_v37 }
  0xf1   : > { %v1229_v57 = vadd.f32 %v1228_v48, %v1227_v35  ;;  %v1238_v58 = vadd.f32 %v1237_v51, %v1236_v36  ;;  %v1045_v6 = vadd.f32 %v1044_v53, %v1043_v38  ;;  %v2884_v7 = vpop.trf.xlu1  ;;  %914 = vxpose.xlu1.b32.cont [6/16] (narrow) %v866_v47, 32  ;;  %v852_v38 = vld [vmem:[%s2778_s19 + $0x38] sm:$0xff] }
  0xf2   : > { %v2886_v17 = vpop.trf.xlu0  ;;  %v1128_v16 = vmul.f32 %v2884_v7, %v2884_v7  ;;  %882 = vxpose.xlu0.b32.cont [6/16] (narrow) %v850_v54, 32  ;;  %v1055_v13 = vrot.slane %v1054_v8, 2 }
  0xf3   : > { %v1127_v10 = vmul.f32 %v2886_v17, %v2886_v17  ;;  %v1230_v24 = vrot.slane %v1229_v57, 2  ;;  %v1239_v12 = vrot.slane %v1238_v58, 2  ;;  %v1046_v14 = vrot.slane %v1045_v6, 2 }
  0xf4   : > { %v1142_v18 = vadd.f32 %v1128_v16, %v1126_v55  ;;  %v1056_v27 = vadd.f32 %v1055_v13, %v1054_v8  ;;  %v869_v8 = vld [vmem:[%s2778_s19 + $0xc0] sm:$0xff] }
  0xf5   : > { %v1133_v19 = vadd.f32 %v1127_v10, %v1125_v56  ;;  %v1231_v23 = vadd.f32 %v1230_v24, %v1229_v57  ;;  %v1240_v26 = vadd.f32 %v1239_v12, %v1238_v58  ;;  %v1047_v28 = vadd.f32 %v1046_v14, %v1045_v6  ;;  %v2894_v29 = vpop.trf.xlu1  ;;  %915 = vxpose.xlu1.b32.cont [7/16] (narrow) %v867_v25, 32  ;;  %v853_v25 = vld [vmem:[%s2778_s19 + $0x40] sm:$0xff] }
  0xf6   : > { %v2896_v30 = vpop.trf.xlu0  ;;  %v1130_v31 = vmul.f32 %v2894_v29, %v2894_v29  ;;  %883 = vxpose.xlu0.b32.cont [7/16] (narrow) %v851_v15, 32  ;;  %v1057_v36 = vrot.slane %v1056_v27, 1  ;;  %v870_v15 = vld [vmem:[%s2778_s19 + $0xc8] sm:$0xff] }
  0xf7   : > { %v1129_v32 = vmul.f32 %v2896_v30, %v2896_v30  ;;  %v1232_v34 = vrot.slane %v1231_v23, 1  ;;  %v1241_v35 = vrot.slane %v1240_v26, 1  ;;  %v1048_v37 = vrot.slane %v1047_v28, 1 }
  0xf8   : > { %v1143_v47 = vadd.f32 %v1142_v18, %v1130_v31  ;;  %v1058_v53 = vadd.f32 %v1057_v36, %v1056_v27  ;;  %v854_v18 = vld [vmem:[%s2778_s19 + $0x48] sm:$0xff]  ;;  %v855_v31 = vld [vmem:[%s2778_s19 + $0x50] sm:$0xff]  ;;  %v872_v36 = vld [vmem:[%s2778_s19 + $0xd8] sm:$0xff] }
  0xf9   : > { %v1134_v48 = vadd.f32 %v1133_v19, %v1129_v32  ;;  %v2904_v51 = vadd.f32 %v1232_v34, %v1231_v23  ;;  %v2906_v52 = vadd.f32 %v1241_v35, %v1240_v26  ;;  %v1049_v54 = vadd.f32 %v1048_v37, %v1047_v28  ;;  %v2908_v55 = vpop.trf.xlu1  ;;  %916 = vxpose.xlu1.b32.cont [8/16] (narrow) %v868_v33, 32  ;;  %v871_v28 = vld [vmem:[%s2778_s19 + $0xd0] sm:$0xff] }
  0xfa   : > { %v2910_v56 = vpop.trf.xlu0  ;;  %v1132_v57 = vmul.f32 %v2908_v55, %v2908_v55  ;;  %884 = vxpose.xlu0.b32.cont [8/16] (narrow) %v852_v38, 32  ;;  %v1060_v16 = vmax.f32 %v1058_v53, 1e-30  ;;  %v856_v38 = vld [vmem:[%s2778_s19 + $0x58] sm:$0xff] }
  0xfb   : > { %v1131_v58 = vmul.f32 %v2910_v56, %v2910_v56  ;;  %v1319_v6 = vcombine.low %v2904_v51, %v2906_v52  ;;  %v1059_v10 = vmax.f32 %v1049_v54, 1e-30 }
  0xfc   : > { %v1144_v24 = vadd.f32 %v1143_v47, %v1132_v57  ;;  %2377 = vrsqrt.f32 %v1060_v16 }
  0xfd   : > { %v1135_v12 = vadd.f32 %v1134_v48, %v1131_v58  ;;  %917 = vxpose.xlu1.b32.cont [9/16] (narrow) %v869_v8, 32  ;;  %2379 = vrsqrt.f32 %v1059_v10 }
  0xfe   : > { %v1145_v13 = vrot.slane %v1144_v24, 4  ;;  %885 = vxpose.xlu0.b32.cont [9/16] (narrow) %v853_v25, 32  ;;  %v873_v25 = vld [vmem:[%s2778_s19 + $0xe0] sm:$0xff] }
  0xff   : > { %v1136_v14 = vrot.slane %v1135_v12, 4 }
 0x100   : > { %v1146_v19 = vadd.f32 %v1145_v13, %v1144_v24 }
 0x101   : > { %v1137_v23 = vadd.f32 %v1136_v14, %v1135_v12  ;;  %918 = vxpose.xlu1.b32.cont [10/16] (narrow) %v870_v15, 32  ;;  %v857_v12 = vld [vmem:[%s2778_s19 + $0x60] sm:$0xff]  ;;  %v858_v14 = vld [vmem:[%s2778_s19 + $0x68] sm:$0xff] }
 0x102   : > { %v1147_v26 = vrot.slane %v1146_v19, 2  ;;  %886 = vxpose.xlu0.b32.cont [10/16] (narrow) %v854_v18, 32  ;;  %v875_v18 = vld [vmem:[%s2778_s19 + $0xf0] sm:$0xff] }
 0x103   : > { %v1138_v27 = vrot.slane %v1137_v23, 2 }
 0x104   : > { %v1148_v32 = vadd.f32 %v1147_v26, %v1146_v19  ;;  %v859_v19 = vld [vmem:[%s2778_s19 + $0x70] sm:$0xff] }
 0x105   : > { %v1139_v33 = vadd.f32 %v1138_v27, %v1137_v23  ;;  %919 = vxpose.xlu1.b32.cont [11/16] (narrow) %v871_v28, 32  ;;  %v876_v27 = vld [vmem:[%s2778_s19 + $0xf8] sm:$0xff] }
 0x106   : > { %v1149_v34 = vrot.slane %v1148_v32, 1  ;;  %887 = vxpose.xlu0.b32.cont [11/16] (narrow) %v855_v31, 32  ;;  %v2378_v37 = vpop.eup %2377 }
 0x107   : > { %v1140_v35 = vrot.slane %v1139_v33, 1  ;;  %v2380_v47 = vpop.eup %2379  ;;  %v1064_v48 = vmul.f32 %v2378_v37, %v1058_v53  ;;  %v874_v53 = vld [vmem:[%s2778_s19 + $0xe8] sm:$0xff] }
 0x108   : > { %v1150_v57 = vadd.f32 %v1149_v34, %v1148_v32  ;;  %v1063_v8 = vmul.f32 %v2380_v47, %v1049_v54  ;;  %v1088_v26 = vcombine.low %v2380_v47, %v2378_v37  ;;  %v860_v32 = vld [vmem:[%s2778_s19 + $0x78] sm:$0xff] }
 0x109   : > { %v1141_v58 = vadd.f32 %v1140_v35, %v1139_v33  ;;  %920 = vxpose.xlu1.b32.cont [12/16] (narrow) %v872_v36, 32 }
 0x10a   : > { %v1152_v16 = vmax.f32 %v1150_v57, 1e-30  ;;  %888 = vxpose.xlu0.b32.cont [12/16] (narrow) %v856_v38, 32  ;;  %v1067_v24 = vcombine.low %v1063_v8, %v1064_v48  ;;  %v1095_v34 = vrot.slane %v1088_v26, %v2754_v11 }
 0x10b   : > { %v1151_v10 = vmax.f32 %v1141_v58, 1e-30 }
 0x10c   : > { %2381 = vrsqrt.f32 %v1152_v16  ;;  %v1074_v13 = vrot.slane %v1067_v24, %v2754_v11  ;;  %v1102_v8 = vrot.slane %v1095_v34, %v2754_v11 }
 0x10d   : > { %2383 = vrsqrt.f32 %v1151_v10  ;;  %921 = vxpose.xlu1.b32.cont [13/16] (narrow) %v873_v25, 32 }
 0x10e   : > { %889 = vxpose.xlu0.b32.cont [13/16] (narrow) %v857_v12, 32  ;;  %v1081_v54 = vrot.slane %v1074_v13, %v2754_v11 }
 0x110   : > { %v1083_v15 = vmul.f32 %v1081_v54, %v2762_v21 }
 0x111   : > { %922 = vxpose.xlu1.b32.cont [14/16] (narrow) %v874_v53, 32 }
 0x112   : > { %890 = vxpose.xlu0.b32.cont [14/16] (narrow) %v858_v14, 32  ;;  %2385 = vtanh.f32 %v1083_v15 }
 0x115   : > { %923 = vxpose.xlu1.b32.cont [15/16] (narrow) %v875_v18, 32 }
 0x116   : > { %v2382_v23 = vpop.eup %2381  ;;  %891 = vxpose.xlu0.b32.cont [15/16] (narrow) %v859_v19, 32 }
 0x117   : > { %v2384_v28 = vpop.eup %2383  ;;  %v1156_v31 = vmul.f32 %v2382_v23, %v1150_v57 }
 0x118   : > { %v1155_v33 = vmul.f32 %v2384_v28, %v1141_v58  ;;  %v1180_v10 = vcombine.low %v2384_v28, %v2382_v23 }
 0x119   : > { %924 = vxpose.xlu1.b32.end [16/16] (narrow) %v876_v27, 32 }
 0x11a   : > { %v1159_v35 = vcombine.low %v1155_v33, %v1156_v31  ;;  %892 = vxpose.xlu0.b32.end [16/16] (narrow) %v860_v32, 32  ;;  %v1187_v24 = vrot.slane %v1180_v10, %v2754_v11 }
 0x11c   : > { %v1166_v36 = vrot.slane %v1159_v35, %v2754_v11  ;;  %v2386_v38 = vpop.eup %2385 }
 0x11d   : > { %v1085_v48 = vmin.f32 %v2386_v38, 0.996 }
 0x11e   : > { %v1173_v16 = vrot.slane %v1166_v36, %v2754_v11 }
 0x11f   : > { %v1104_v37 = vmul.f32 %v1102_v8, %v1085_v48 }
 0x120   : > { %v1175_v47 = vmul.f32 %v1173_v16, %v2762_v21 }
 0x121   : > { %v1105_v57 = vmul.f32 %v2787_v41, %v1104_v37 }
 0x122   : > { %2387 = vtanh.f32 %v1175_v47 }
 0x123   : > { %v1110_v58 = vrot.slane %v1105_v57, %v2792_v44  ;;  %v1114_v25 = vrot.slane %v1105_v57, %v2795_v46 }
 0x125   : > { %v2947_v12 = vmul.f32 %v1110_v58, %v2785_v40  ;;  %v2950_v13 = vmul.f32 %v1114_v25, %v2783_v39  ;;  %v2953_v53 = vmul.f32 %v1110_v58, %v2800_v50  ;;  %v2956_v54 = vmul.f32 %v1114_v25, %v2798_v49 }
 0x126   : > { %v2959_v14 = vmul.f32 %v1110_v58, %v2828_v4  ;;  %v2962_v15 = vmul.f32 %v1114_v25, %v2826_v1  ;;  %v2965_v18 = vmul.f32 %v1110_v58, %v2862_v22  ;;  %v2968_v40 = vmul.f32 %v1114_v25, %v2860_v20 }
 0x127   : > { %v1243_v39 = vmul.f32 %v2947_v12, %v2947_v12  ;;  %v1244_v50 = vmul.f32 %v2950_v13, %v2950_v13  ;;  %v1245_v49 = vmul.f32 %v2953_v53, %v2953_v53  ;;  %v1246_v4 = vmul.f32 %v2956_v54, %v2956_v54 }
 0x128   : > { %v1247_v1 = vmul.f32 %v2959_v14, %v2959_v14  ;;  %v1248_v22 = vmul.f32 %v2962_v15, %v2962_v15  ;;  %v1194_v20 = vrot.slane %v1187_v24, %v2754_v11  ;;  %v1269_v26 = vmul.f32 %v2947_v12, %v2815_v60 }
 0x129   : > { %v1251_v19 = vadd.f32 %v1245_v49, %v1243_v39  ;;  %v1260_v23 = vadd.f32 %v1246_v4, %v1244_v50  ;;  %v1270_v27 = vmul.f32 %v2950_v13, %v2818_v61  ;;  %v1271_v28 = vmul.f32 %v2953_v53, %v2821_v62 }
 0x12a   : > { %v1272_v31 = vmul.f32 %v2956_v54, %v2824_v63  ;;  %v1273_v32 = vmul.f32 %v2959_v14, %v2831_v5  ;;  %v1274_v33 = vmul.f32 %v2962_v15, %v2834_v3  ;;  %v1249_v35 = vmul.f32 %v2965_v18, %v2965_v18 }
 0x12b   : > { %v1250_v36 = vmul.f32 %v2968_v40, %v2968_v40  ;;  %v1252_v38 = vadd.f32 %v1251_v19, %v1247_v1  ;;  %v1261_v48 = vadd.f32 %v1260_v23, %v1248_v22  ;;  %v1277_v8 = vadd.f32 %v1271_v28, %v1269_v26 }
 0x12c   : > { %v2388_v34 = vpop.eup %2387  ;;  %v1286_v16 = vadd.f32 %v1272_v31, %v1270_v27  ;;  %v1275_v57 = vmul.f32 %v2965_v18, %v2837_v2  ;;  %v1276_v58 = vmul.f32 %v2968_v40, %v2840_v9 }
 0x12d   : > { %v1177_v37 = vmin.f32 %v2388_v34, 0.996  ;;  %v1253_v47 = vadd.f32 %v1252_v38, %v1249_v35  ;;  %v1262_v10 = vadd.f32 %v1261_v48, %v1250_v36  ;;  %v1278_v25 = vadd.f32 %v1277_v8, %v1273_v32 }
 0x12e   : > { %v1287_v24 = vadd.f32 %v1286_v16, %v1274_v33  ;;  %v1326_v16 = vrot.slane %v1319_v6, %v2754_v11  ;;  %v3028_v6 = vmul.f32 %v2735_v45, %v2735_v45 }
 0x12f   : > { %v1196_v39 = vmul.f32 %v1194_v20, %v1177_v37  ;;  %v1254_v50 = vrot.slane %v1253_v47, 4  ;;  %v1263_v49 = vrot.slane %v1262_v10, 4  ;;  %v1279_v4 = vadd.f32 %v1278_v25, %v1275_v57 }
 0x130   : > { %v1288_v59 = vadd.f32 %v1287_v24, %v1276_v58  ;;  %3872 = vst [vmem:[#allocation13_spill] sm:$0xff] %v3028_v6 }
 0x131   : > { %v1197_v1 = vmul.f32 %v2787_v41, %v1196_v39  ;;  %v1255_v22 = vadd.f32 %v1254_v50, %v1253_v47  ;;  %v1264_v19 = vadd.f32 %v1263_v49, %v1262_v10  ;;  %v1280_v23 = vrot.slane %v1279_v4, 4  ;;  %v3020_v47 = vpop.trf.xlu1 }
 0x132   : > { %v1289_v26 = vrot.slane %v1288_v59, 4  ;;  %v1333_v39 = vrot.slane %v1326_v16, %v2754_v11 }
 0x133   : > { %v1202_v27 = vrot.slane %v1197_v1, %v2792_v44  ;;  %v1256_v28 = vrot.slane %v1255_v22, 2  ;;  %v1265_v31 = vrot.slane %v1264_v19, 2  ;;  %v1281_v34 = vadd.f32 %v1280_v23, %v1279_v4 }
 0x134   : > { %v1290_v35 = vadd.f32 %v1289_v26, %v1288_v59 }
 0x135   : > { %v3006_v32 = vmul.f32 %v1202_v27, %v2876_v43  ;;  %v3009_v20 = vmul.f32 %v1202_v27, %v2886_v17  ;;  %v1257_v33 = vadd.f32 %v1256_v28, %v1255_v22  ;;  %v1266_v36 = vadd.f32 %v1265_v31, %v1264_v19  ;;  %v3031_v19 = vpop.trf.xlu0  ;;  %v3034_v26 = vpop.trf.xlu1 }
 0x136   : > { %v3012_v38 = vmul.f32 %v1202_v27, %v2896_v30  ;;  %v1282_v48 = vrot.slane %v1281_v34, 2  ;;  %v1291_v8 = vrot.slane %v1290_v35, 2  ;;  %v1335_v31 = vmul.f32 %v1333_v39, %v3028_v6 }
 0x137   : > { %3869 = vst [vmem:[#allocation10_spill] sm:$0xff] %v3006_v32  ;;  %3870 = vst [vmem:[#allocation11_spill] sm:$0xff] %v3009_v20  ;;  %v1258_v37 = vrot.slane %v1257_v33, 1  ;;  %v1267_v59 = vrot.slane %v1266_v36, 1  ;;  %v1773_v43 = vmul.f32 %v3006_v32, %v3006_v32  ;;  %v1775_v30 = vmul.f32 %v3009_v20, %v3009_v20 }
 0x138   : > { %3871 = vst [vmem:[#allocation12_spill] sm:$0xff] %v3012_v38  ;;  %v1283_v17 = vadd.f32 %v1282_v48, %v1281_v34  ;;  %v1292_v10 = vadd.f32 %v1291_v8, %v1290_v35  ;;  %v1777_v57 = vmul.f32 %v3012_v38, %v3012_v38  ;;  %v1506_v35 = vadd.s32 8, %v2747_v0 }
 0x139   : > { %v1259_v58 = vadd.f32 %v1258_v37, %v1257_v33  ;;  %v1268_v25 = vadd.f32 %v1267_v59, %v1266_v36  ;;  %v1781_v52 = vadd.f32 %v1775_v30, %v1773_v43  ;;  %v3040_v33 = vmul.f32 2.0, %v2735_v45  ;;  %v3044_v16 = vpop.trf.xlu0  ;;  %v3046_v59 = vpop.trf.xlu1 }
 0x13a   : > { %v1284_v24 = vrot.slane %v1283_v17, 1  ;;  %v1293_v51 = vrot.slane %v1292_v10, 1  ;;  %v1520_v37 = vand.u32 1, %v1506_v35  ;;  %v1206_v30 = vrot.slane %v1197_v1, %v2795_v46 }
 0x13b   : > { %v1338_v50 = vcombine.low %v1259_v58, %v1268_v25  ;;  %v1782_v22 = vadd.f32 %v1781_v52, %v1777_v57  ;;  %3873 = vst [vmem:[#allocation14_spill] sm:$0xff] %v3040_v33  ;;  %v3818_v57 = vrot.slane %v3020_v47, 7  ;;  %v3875_v52 = vmov 0 }
 0x13c   : > { %v1285_v49 = vadd.f32 %v1284_v24, %v1283_v17  ;;  %v1294_v4 = vadd.f32 %v1293_v51, %v1292_v10  ;;  %v3819_v17 = vrot.slane %v3034_v26, 7  ;;  %v3817_v10 = vrot.slane %v3046_v59, 1 }
 0x13d   : > { %v1345_v23 = vrot.slane %v1338_v50, %v2754_v11  ;;  %v3055_v24 = vmul.f32 %v1202_v27, %v2910_v56  ;;  %v1564_v51 = vrot.slane %v3034_v26, 1  ;;  %vm3060_vm4 = vcmp.eq.s32.totalorder %v1520_v37, 0 }
 0x13e   : > { %v1298_v28 = vcombine.low %v1285_v49, %v1294_v4  ;;  %v3876_v52 = vsel %vm3060_vm4, 4294967295, %v3875_v52  ;;  %v1592_v56 = vsel %vm1586_vm3, %v3818_v57, %v3819_v17  ;;  %v3074_v49 = vpop.trf.xlu0  ;;  %v3077_v4 = vmul.f32 %v1206_v30, %v2884_v7 }
 0x13f   : > { %v1352_v34 = vrot.slane %v1345_v23, %v2754_v11  ;;  %3874 = vst [vmem:[#allocation15_spill] sm:$0xff] %v3055_v24  ;;  %3877 = vst [vmem:[#allocation16_spill] sm:$0xff] %v3876_v52  ;;  %v1573_v27 = vsel %vm1569_vm2, %v1564_v51, %v3817_v10  ;;  %v1580_v23 = vrot.slane %v3044_v16, 7  ;;  %v3083_v35 = vmul.f32 %v1206_v30, %v2894_v29 }
 0x140   : > { %v1305_v36 = vrot.slane %v1298_v28, %v2754_v11  ;;  %3878 = vst [vmem:[#allocation17_spill] sm:$0xff] %v3077_v4  ;;  %v3816_v28 = vrot.slane %v3074_v49, 1  ;;  %v1563_v7 = vrot.slane %v3044_v16, 1  ;;  %v3092_v37 = vsel %vm3060_vm4, %v1573_v27, %v1592_v56 }
 0x141   : > { %v1354_v48 = vmul.f32 %v1352_v34, %v1335_v31  ;;  %v1359_v25 = vmul.f32 %v1352_v34, %v2735_v45  ;;  %v1513_v31 = vand.u32 1, %v2747_v0  ;;  %3879 = vst [vmem:[#allocation18_spill] sm:$0xff] %v3083_v35  ;;  %v3097_v29 = vmul.f32 %v1206_v30, %v2908_v55 }
 0x142   : > { %v1312_v8 = vrot.slane %v1305_v36, %v2754_v11  ;;  %v1779_v36 = vmul.f32 %v3055_v24, %v3055_v24  ;;  %v1776_v55 = vmul.f32 %v3077_v4, %v3077_v4  ;;  %v1778_v27 = vmul.f32 %v3083_v35, %v3083_v35 }
 0x143   : > { %3880 = vst [vmem:[#allocation19_spill] sm:$0xff] %v3097_v29  ;;  %vm3124_vm5 = vcmp.eq.s32.totalorder %v1513_v31, 0  ;;  %v1562_v10 = vrot.slane %v3020_v47, 1  ;;  %v3836_v57 = vrot.slane %v3031_v19, 1  ;;  %v3889_v35 = vrot.slane %v3046_v59, 1 }
 0x144   : > { %v1314_v43 = vmul.f32 %v1312_v8, %v3040_v33  ;;  %v3815_v8 = vrot.slane %v3031_v19, 7 }
 0x146   : > { %v1315_v58 = vadd.f32 1.0, %v1314_v43  ;;  %v1507_v43 = vadd.s32 16, %v2747_v0  ;;  %v1591_v56 = vsel %vm1586_vm3, %v3815_v8, %v1580_v23 }
 0x148   : > { %v1355_v50 = vadd.f32 %v1354_v48, %v1315_v58  ;;  %v1360_v1 = vadd.f32 %v1359_v25, %v1315_v58  ;;  %v1508_v48 = vadd.s32 24, %v2747_v0  ;;  %v1362_v58 = vmul.f32 %v1333_v39, %v2735_v45 }
 0x149   : > { %v3100_v25 = vmul.f32 %v1206_v30, %v2874_v42  ;;  %v1572_v45 = vsel %vm1569_vm2, %v1563_v7, %v3816_v28  ;;  %v1783_v39 = vadd.f32 %v1782_v22, %v1779_v36  ;;  %v1654_v42 = vmul.f32 %v3092_v37, %v3092_v37  ;;  %v3128_v28 = vpop.trf.xlu1 }
 0x14a   : > { %v1356_v34 = vmax.f32 %v1355_v50, 1e-15  ;;  %v1646_v50 = vmul.f32 %v3034_v26, %v3034_v26  ;;  %v1780_v22 = vmul.f32 %v3097_v29, %v3097_v29  ;;  %v1527_v17 = vand.u32 1, %v1507_v43 }
 0x14b   : > { %3881 = vst [vmem:[#allocation20_spill] sm:$0xff] %v3100_v25  ;;  %v1774_v30 = vmul.f32 %v3100_v25, %v3100_v25  ;;  %v1534_v21 = vand.u32 1, %v1508_v48  ;;  %v1363_v6 = vsub.f32 1.0, %v1362_v58  ;;  %v1784_v33 = vrot.slane %v1783_v39, 4 }
 0x14c   : > { %2389 = vrcp.f32 %v1356_v34  ;;  %v3122_v34 = vsel %vm3060_vm4, %v1572_v45, %v1591_v56  ;;  %v3134_v56 = vadd.f32 %v1654_v42, %v1646_v50  ;;  %v3138_v45 = vmul.f32 %v3020_v47, %v3020_v47 }
 0x14d   : > { %v1790_v36 = vadd.f32 %v1776_v55, %v1774_v30  ;;  %v1645_v25 = vmul.f32 %v3044_v16, %v3044_v16  ;;  %v1653_v55 = vmul.f32 %v3122_v34, %v3122_v34  ;;  %v1585_v30 = vrot.slane %v3128_v28, 7 }
 0x14e   : > { %v1583_v43 = vrot.slane %v3046_v59, 7  ;;  %v1568_v58 = vrot.slane %v3128_v28, 1  ;;  %v3150_v42 = vmul.f32 %v3031_v19, %v3031_v19  ;;  %v3162_v29 = vmul.f32 %v3046_v59, %v3046_v59 }
 0x14f   : > { %v1791_v31 = vadd.f32 %v1790_v36, %v1778_v27  ;;  %v1575_v27 = vsel %vm1569_vm2, %v1562_v10, %v1564_v51  ;;  %v3158_v36 = vsel %vm1569_vm2, %v3836_v57, %v1563_v7  ;;  %v1785_v24 = vadd.f32 %v1784_v33, %v1783_v39 }
 0x150   : > { %v3885_v51 = vrot.slane %v3074_v49, 7  ;;  %v3175_v4 = vadd.f32 %v1653_v55, %v1645_v25  ;;  %vm3177_vm6 = vcmp.eq.s32.totalorder %v1527_v17, 0  ;;  %v3888_v33 = vrot.slane %v3020_v47, 7 }
 0x151   : > { %v1792_v50 = vadd.f32 %v1791_v31, %v1780_v22  ;;  %v3884_v22 = vrot.slane %v3034_v26, 7  ;;  %v1588_v17 = vsel %vm1586_vm3, %v1583_v43, %v1585_v30  ;;  %vm3199_vm7 = vcmp.eq.s32.totalorder %v1534_v21, 0 }
 0x152   : > { %v3173_v38 = vsel %vm1586_vm3, %v1580_v23, %v3885_v51  ;;  %v1594_v39 = vsel %vm1586_vm3, %v1585_v30, %v3888_v33  ;;  %v1571_v23 = vsel %vm1569_vm2, %v3889_v35, %v1568_v58  ;;  %v1786_v35 = vrot.slane %v1785_v24, 2 }
 0x153   : > { %v1590_v31 = vsel %vm1586_vm3, %v3884_v22, %v1583_v43  ;;  %v3185_v22 = vpop.trf.xlu0 }
 0x154   : > { %v1584_v30 = vrot.slane %v3185_v22, 7 }
 0x156   : > { %v2390_v48 = vpop.eup %2389 }
 0x157   : > { %v1361_v7 = vmul.f32 %v2390_v48, %v1360_v1  ;;  %v1364_v57 = vmul.f32 %v2390_v48, %v1363_v6  ;;  %v1577_v6 = vsel %vm1569_vm2, %v1568_v58, %v1562_v10  ;;  %v1793_v1 = vrot.slane %v1792_v50, 4 }
 0x158   : > { %v3205_v10 = vsel %vm3124_vm5, %v1575_v27, %v1594_v39 }
 0x159   : > { %v1369_v25 = vrot.slane %v1361_v7, %v2792_v44  ;;  %v1373_v55 = vrot.slane %v1361_v7, %v2795_v46  ;;  %v1388_v48 = vrot.slane %v1364_v57, %v2792_v44  ;;  %v1392_v51 = vrot.slane %v1364_v57, %v2795_v46 }
 0x15a   : > { %v1794_v43 = vadd.f32 %v1793_v1, %v1792_v50 }
 0x15b   : > { %v1376_v58 = vmul.f32 %v1369_v25, %v2815_v60  ;;  %v1377_v7 = vmul.f32 %v1373_v55, %v2818_v61  ;;  %v1378_v20 = vmul.f32 %v1369_v25, %v2821_v62  ;;  %v1379_v57 = vmul.f32 %v1373_v55, %v2824_v63 }
 0x15c   : > { %v1380_v21 = vmul.f32 %v1369_v25, %v2831_v5  ;;  %v1381_v11 = vmul.f32 %v1373_v55, %v2834_v3  ;;  %v1382_v52 = vmul.f32 %v1369_v25, %v2837_v2  ;;  %v1383_v27 = vmul.f32 %v1373_v55, %v2840_v9 }
 0x15d   : > { %v1395_v39 = vmul.f32 %v1388_v48, %v2947_v12  ;;  %v1396_v50 = vmul.f32 %v1392_v51, %v2950_v13  ;;  %v1397_v60 = vmul.f32 %v1388_v48, %v2953_v53  ;;  %v1398_v61 = vmul.f32 %v1392_v51, %v2956_v54 }
 0x15e   : > { %v1399_v62 = vmul.f32 %v1388_v48, %v2959_v14  ;;  %v1400_v63 = vmul.f32 %v1392_v51, %v2962_v15  ;;  %v1401_v5 = vmul.f32 %v1388_v48, %v2965_v18  ;;  %v1402_v3 = vmul.f32 %v1392_v51, %v2968_v40 }
 0x15f   : > { %v3224_v1 = vadd.f32 %v1395_v39, %v1376_v58  ;;  %v3226_v2 = vadd.f32 %v1396_v50, %v1377_v7  ;;  %v3228_v9 = vadd.f32 %v1397_v60, %v1378_v20  ;;  %v3230_v12 = vadd.f32 %v1398_v61, %v1379_v57 }
 0x160   : > { %v3232_v13 = vadd.f32 %v1399_v62, %v1380_v21  ;;  %v3234_v53 = vadd.f32 %v1400_v63, %v1381_v11  ;;  %v3236_v54 = vadd.f32 %v1401_v5, %v1382_v52  ;;  %v3238_v14 = vadd.f32 %v1402_v3, %v1383_v27 }
 0x161   : > { %v1411_v15 = vmul.f32 %v3224_v1, %v3224_v1  ;;  %v1412_v18 = vmul.f32 %v3226_v2, %v3226_v2  ;;  %v1413_v40 = vmul.f32 %v3228_v9, %v3228_v9  ;;  %v1414_v20 = vmul.f32 %v3230_v12, %v3230_v12 }
 0x162   : > { %v1787_v25 = vadd.f32 %v1786_v35, %v1785_v24  ;;  %v3250_v11 = vsel %vm3177_vm6, %v1571_v23, %v1590_v31  ;;  %v1567_v52 = vrot.slane %v3185_v22, 1  ;;  %v3892_v55 = vrot.slane %v3031_v19, 7 }
 0x163   : > { %v1415_v51 = vmul.f32 %v3232_v13, %v3232_v13  ;;  %v1416_v58 = vmul.f32 %v3234_v53, %v3234_v53  ;;  %v1419_v7 = vadd.f32 %v1413_v40, %v1411_v15  ;;  %v1428_v57 = vadd.f32 %v1414_v20, %v1412_v18 }
 0x164   : > { %v1593_v48 = vsel %vm1586_vm3, %v1584_v30, %v3892_v55  ;;  %v1417_v24 = vmul.f32 %v3236_v54, %v3236_v54  ;;  %v3265_v31 = vsel %vm3199_vm7, %v1577_v6, %v1588_v17  ;;  %v1652_v23 = vmul.f32 %v3205_v10, %v3205_v10 }
 0x165   : > { %v3893_v35 = vrot.slane %v3074_v49, 1  ;;  %v1418_v27 = vmul.f32 %v3238_v14, %v3238_v14  ;;  %v1420_v39 = vadd.f32 %v1419_v7, %v1415_v51  ;;  %v1429_v50 = vadd.f32 %v1428_v57, %v1416_v58 }
 0x166   : > { %v1795_v60 = vrot.slane %v1794_v43, 2  ;;  %v1788_v61 = vrot.slane %v1787_v25, 1  ;;  %v1656_v62 = vmul.f32 %v3250_v11, %v3250_v11  ;;  %v3894_v6 = vrot.slane %v3031_v19, 1 }
 0x167   : > { %v1570_v21 = vsel %vm1569_vm2, %v3893_v35, %v1567_v52  ;;  %v3284_v63 = vsel %vm3124_vm5, %v3158_v36, %v1593_v48  ;;  %v1421_v5 = vadd.f32 %v1420_v39, %v1417_v24  ;;  %v1430_v3 = vadd.f32 %v1429_v50, %v1418_v27 }
 0x168   : > { %v1576_v17 = vsel %vm1569_vm2, %v1567_v52, %v3894_v6  ;;  %v3895_v15 = vrot.slane %v3074_v49, 7  ;;  %v3293_v40 = vsel %vm3177_vm6, %v1570_v21, %v3173_v38  ;;  %v1647_v20 = vmul.f32 %v3074_v49, %v3074_v49 }
 0x169   : > { %v1650_v52 = vmul.f32 %v3128_v28, %v3128_v28  ;;  %v1658_v36 = vmul.f32 %v3265_v31, %v3265_v31  ;;  %v1796_v55 = vadd.f32 %v1795_v60, %v1794_v43  ;;  %v1422_v48 = vrot.slane %v1421_v5, 4 }
 0x16a   : > { %v1587_v18 = vsel %vm1586_vm3, %v3895_v15, %v1584_v30  ;;  %v1431_v51 = vrot.slane %v1430_v3, 4  ;;  %v1660_v58 = vadd.f32 %v1652_v23, %v3138_v45  ;;  %v1651_v30 = vmul.f32 %v3284_v63, %v3284_v63 }
 0x16b   : > { %v3304_v7 = vadd.f32 %v1788_v61, %v1787_v25  ;;  %v3308_v38 = vsel %vm3199_vm7, %v1576_v17, %v1587_v18  ;;  %v1655_v57 = vmul.f32 %v3293_v40, %v3293_v40  ;;  %v1797_v24 = vrot.slane %v1796_v55, 1 }
 0x16c   : > { %v1423_v35 = vadd.f32 %v1422_v48, %v1421_v5  ;;  %v1432_v21 = vadd.f32 %v1431_v51, %v1430_v3  ;;  %v1669_v43 = vmax.f32 %v3175_v4, 1e-30  ;;  %v1664_v27 = vadd.f32 %v1656_v62, %v3162_v29 }
 0x16d   : > { %v1666_v45 = vadd.f32 %v1658_v36, %v1650_v52  ;;  %v1649_v23 = vmul.f32 %v3185_v22, %v3185_v22  ;;  %v3316_v25 = vadd.f32 %v1797_v24, %v1796_v55  ;;  %v1657_v60 = vmul.f32 %v3308_v38, %v3308_v38 }
 0x16e   : > { %v1424_v39 = vrot.slane %v1423_v35, 2  ;;  %v1433_v50 = vrot.slane %v1432_v21, 2  ;;  %v1659_v61 = vadd.f32 %v1651_v30, %v3150_v42  ;;  %v3897_v6 = vmax.f32 %v3134_v56, 1e-30  ;;  %v3331_v30 = vpop.trf.xlu1 }
 0x16f   : > { %3896 = vst [vmem:[#allocation21_spill] sm:$0xff] %v3316_v25  ;;  %v1668_v17 = vmax.f32 %v1660_v58, 1e-30  ;;  %v1663_v4 = vadd.f32 %v1655_v57, %v1647_v20  ;;  %v1672_v3 = vmax.f32 %v1664_v27, 1e-30  ;;  %v1665_v36 = vadd.f32 %v1657_v60, %v1649_v23  ;;  %3898 = vst [vmem:[#allocation22_spill] sm:$0xff] %v3331_v30 }
 0x170   : > { %2391 = vrsqrt.f32 %v3897_v6  ;;  %v1425_v62 = vadd.f32 %v1424_v39, %v1423_v35  ;;  %v1434_v5 = vadd.f32 %v1433_v50, %v1432_v21  ;;  %v1674_v15 = vmax.f32 %v1666_v45, 1e-30  ;;  %v3334_v21 = vpop.trf.xlu0 }
 0x171   : > { %2393 = vrsqrt.f32 %v1669_v43  ;;  %v1667_v55 = vmax.f32 %v1659_v61, 1e-30  ;;  %v1671_v48 = vmax.f32 %v1663_v4, 1e-30  ;;  %v1673_v58 = vmax.f32 %v1665_v36, 1e-30 }
 0x172   : > { %v1426_v18 = vrot.slane %v1425_v62, 1  ;;  %v1435_v52 = vrot.slane %v1434_v5, 1  ;;  %2395 = vrsqrt.f32 %v1668_v17  ;;  %v1437_v35 = vmul.f32 0.996, %v2787_v41  ;;  %3899 = vst [vmem:[#allocation23_spill] sm:$0xff] %v3334_v21  ;;  %v3339_v27 = vpop.trf.xlu1 }
 0x173   : > { %2397 = vrsqrt.f32 %v1672_v3  ;;  %3900 = vst [vmem:[#allocation24_spill] sm:$0xff] %v3339_v27 }
 0x174   : > { %v3325_v42 = vadd.f32 %v1426_v18, %v1425_v62  ;;  %v3327_v56 = vadd.f32 %v1435_v52, %v1434_v5  ;;  %2399 = vrsqrt.f32 %v1674_v15  ;;  %v1438_v50 = vmul.f32 %v1437_v35, %v1437_v35  ;;  %v3358_v3 = vpop.trf.xlu0 }
 0x175   : > { %2401 = vrsqrt.f32 %v1667_v55  ;;  %3901 = vst [vmem:[#allocation25_spill] sm:$0xff] %v3358_v3 }
 0x176   : > { %v1452_v20 = vmax.f32 %v3325_v42, 1e-30  ;;  %v1453_v51 = vmax.f32 %v3327_v56, 1e-30  ;;  %2403 = vrsqrt.f32 %v1671_v48 }
 0x178   : > { %2405 = vrsqrt.f32 %v1452_v20  ;;  %v3424_v29 = vpop.trf.xlu0 }
 0x179   : > { %2407 = vrsqrt.f32 %v1453_v51  ;;  %3905 = vst [vmem:[#allocation16_spill] sm:$0xff] %v3424_v29 }
 0x17a   : > { %v2392_v57 = vpop.eup %2391  ;;  %2409 = vrsqrt.f32 %v1673_v58  ;;  %v1940_v58 = vmul.f32 %v3331_v30, %v3331_v30 }
 0x17b   : > { %v2394_v24 = vpop.eup %2393  ;;  %v3337_v43 = vmul.f32 %v2392_v57, %v3092_v37  ;;  %v3345_v61 = vmul.f32 %v2392_v57, %v3034_v26  ;;  %v1443_v26 = vrot.slane %v1438_v50, %v2792_v44  ;;  %v1942_v57 = vmul.f32 %v3339_v27, %v3339_v27 }
 0x17c   : > { %v2396_v45 = vpop.eup %2395  ;;  %v3342_v23 = vmul.f32 %v2394_v24, %v3122_v34  ;;  %v3349_v62 = vmul.f32 %v2394_v24, %v3044_v16  ;;  %v3367_v16 = vpop.trf.xlu1 }
 0x17d   : > { %v2398_v39 = vpop.eup %2397  ;;  %v1718_v17 = vsub.f32 0.0, %v3337_v43  ;;  %v3353_v5 = vmul.f32 %v2396_v45, %v3205_v10  ;;  %v3365_v52 = vmul.f32 %v2396_v45, %v3020_v47  ;;  %3902 = vst [vmem:[#allocation26_spill] sm:$0xff] %v3367_v16  ;;  %v1447_v10 = vrot.slane %v1438_v50, %v2795_v46 }
 0x17e   : > { %v2400_v60 = vpop.eup %2399  ;;  %v1717_v37 = vsub.f32 0.0, %v3342_v23  ;;  %v3356_v34 = vmul.f32 %v2398_v39, %v3250_v11  ;;  %v3362_v18 = vmul.f32 %v2398_v39, %v3046_v59  ;;  %v3904_v39 = vld [vmem:[#allocation5_spill] sm:$0xff]  ;;  %v1956_v55 = vadd.f32 %v1942_v57, %v1940_v58 }
 0x17f   : > { %v2402_v6 = vpop.eup %2401  ;;  %v3375_v48 = vmul.f32 %v2400_v60, %v3128_v28  ;;  %v3378_v20 = vmul.f32 %v2400_v60, %v3265_v31  ;;  %v3383_v47 = vsel %vm3060_vm4, %v1718_v17, %v3345_v61  ;;  %v1716_v24 = vsub.f32 0.0, %v3353_v5 }
 0x180   : > { %v2404_v4 = vpop.eup %2403  ;;  %v3396_v31 = vsel %vm3060_vm4, %v1717_v37, %v3349_v62  ;;  %v1720_v45 = vsub.f32 0.0, %v3356_v34  ;;  %v3406_v17 = vmul.f32 %v2402_v6, %v3284_v63  ;;  %v1939_v63 = vmul.f32 %v3334_v21, %v3334_v21  ;;  %v3431_v28 = vpop.trf.xlu1 }
 0x181   : > { %v1941_v37 = vmul.f32 %v3358_v3, %v3358_v3  ;;  %3906 = vst [vmem:[#allocation5_spill] sm:$0xff] %v3431_v28  ;;  %v3440_v41 = vmul.f32 %v2402_v6, %v3031_v19  ;;  %v3445_v58 = vsel %vm3124_vm5, %v1716_v24, %v3365_v52  ;;  %v1943_v19 = vmul.f32 %v3424_v29, %v3424_v29 }
 0x182   : > { %v2406_v15 = vpop.eup %2405  ;;  %v1715_v3 = vsub.f32 0.0, %v3406_v17  ;;  %v1946_v6 = vmul.f32 %v3431_v28, %v3431_v28  ;;  %vm1450_vm8 = vcmp.gt.f32.partialorder %v3325_v42, %v1443_v26  ;;  %vm1451_vm9 = vcmp.gt.f32.partialorder %v3327_v56, %v1447_v10 }
 0x183   : > { %v2408_v36 = vpop.eup %2407 }
 0x184   : > { %v2410_v59 = vpop.eup %2409  ;;  %v1458_v51 = vcombine.low %v2406_v15, %v2408_v36  ;;  %v3417_v36 = vmul.f32 %v2404_v4, %v3293_v40  ;;  %v1944_v15 = vmul.f32 %v3367_v16, %v3367_v16  ;;  %v1722_v40 = vsub.f32 0.0, %v3378_v20 }
 0x185   : > { %v3451_v16 = vmul.f32 %v2410_v59, %v3185_v22 }
 0x186   : > { %v1465_v50 = vrot.slane %v1458_v51, %v3904_v39  ;;  %v3420_v51 = vmul.f32 %v2410_v59, %v3308_v38  ;;  %v3437_v38 = vsel %vm3177_vm6, %v1720_v45, %v3362_v18  ;;  %v1719_v45 = vsub.f32 0.0, %v3417_v36 }
 0x187   : > { %v1957_v24 = vadd.f32 %v1956_v55, %v1944_v15  ;;  %v3467_v22 = vsel %vm3199_vm7, %v1722_v40, %v3375_v48  ;;  %v3488_v55 = vsel %vm3124_vm5, %v1715_v3, %v3440_v41 }
 0x188   : > { %v1472_v60 = vrot.slane %v1465_v50, %v3904_v39  ;;  %v3448_v50 = vmul.f32 %v2404_v4, %v3074_v49  ;;  %v1721_v27 = vsub.f32 0.0, %v3420_v51  ;;  %v1947_v4 = vadd.f32 %v1941_v37, %v1939_v63 }
 0x189   : > { %v3500_v40 = vadd.f32 %v1957_v24, %v1946_v6 }
 0x18a   : > { %v1474_v57 = vmul.f32 %v1472_v60, %v1437_v35  ;;  %v3473_v60 = vpop.trf.xlu0  ;;  %v3493_v37 = vsel %vm3177_vm6, %v1719_v45, %v3448_v50  ;;  %v3498_v15 = vsel %vm3199_vm7, %v1721_v27, %v3451_v16  ;;  %v1948_v63 = vadd.f32 %v1947_v4, %v1943_v19 }
 0x18b   : > { %3907 = vst [vmem:[#allocation27_spill] sm:$0xff] %v3473_v60 }
 0x18c   : > { %v1479_v35 = vrot.slane %v1474_v57, %v2792_v44  ;;  %v1483_v49 = vrot.slane %v1474_v57, %v2795_v46 }
 0x18e   : > { %v1486_v28 = vsel %vm1450_vm8, %v1479_v35, 1.0  ;;  %v1487_v57 = vsel %vm1451_vm9, %v1483_v49, 1.0 }
 0x18f   : > { %v1491_v26 = vrot.slane %v1486_v28, %v2792_v44  ;;  %v1495_v10 = vrot.slane %v1487_v57, %v2792_v44  ;;  %v1945_v28 = vmul.f32 %v3473_v60, %v3473_v60 }
 0x191   : > { %v1496_v35 = vmul.f32 %v1491_v26, %v3224_v1  ;;  %v3506_v3 = vmul.f32 %v1495_v10, %v3226_v2  ;;  %v1498_v49 = vmul.f32 %v1491_v26, %v3228_v9  ;;  %v1500_v45 = vmul.f32 %v1491_v26, %v3232_v13 }
 0x192   : > { %v1501_v57 = vmul.f32 %v1495_v10, %v3234_v53  ;;  %v1502_v27 = vmul.f32 %v1491_v26, %v3236_v54  ;;  %v1499_v19 = vmul.f32 %v1495_v10, %v3230_v12  ;;  %v3514_v6 = vmul.f32 %v1495_v10, %v3238_v14 }
 0x193   : > { %v1605_v4 = vrot.slane %v1498_v49, 1  ;;  %v1607_v24 = vrot.slane %v1500_v45, 1  ;;  %v1619_v56 = vrot.slane %v1496_v35, 7  ;;  %v1621_v1 = vrot.slane %v1498_v49, 7 }
 0x194   : > { %v1609_v42 = vrot.slane %v1502_v27, 1  ;;  %v1625_v2 = vrot.slane %v1502_v27, 7  ;;  %v1606_v59 = vrot.slane %v1499_v19, 1  ;;  %v1608_v60 = vrot.slane %v1501_v57, 1 }
 0x195   : > { %v1620_v9 = vrot.slane %v3506_v3, 7  ;;  %v1622_v13 = vrot.slane %v1499_v19, 7  ;;  %v1613_v53 = vsel %vm1569_vm2, %v1605_v4, %v1607_v24  ;;  %v3519_v54 = vadd.f32 %v1948_v63, %v1945_v28 }
 0x196   : > { %v1611_v12 = vsel %vm1569_vm2, %v1607_v24, %v1609_v42  ;;  %v1633_v14 = vsel %vm1586_vm3, %v1625_v2, %v1619_v56  ;;  %v1614_v26 = vsel %vm1569_vm2, %v1606_v59, %v1608_v60  ;;  %v1631_v10 = vsel %vm1586_vm3, %v1619_v56, %v1621_v1 }
 0x197   : > { %v1632_v29 = vsel %vm1586_vm3, %v1620_v9, %v1622_v13  ;;  %v1637_v21 = vsel %vm3060_vm4, %v1613_v53, %v1631_v10  ;;  %v3908_v63 = vsel %vm3060_vm4, %v3349_v62, %v3342_v23  ;;  %v1604_v24 = vrot.slane %v3506_v3, 1 }
 0x198   : > { %v1709_v28 = vmul.f32 %v3908_v63, %v1498_v49  ;;  %v1638_v30 = vsel %vm3060_vm4, %v1614_v26, %v1632_v29  ;;  %v1733_v44 = vmul.f32 %v3396_v31, %v1637_v21  ;;  %v1610_v56 = vrot.slane %v3514_v6, 1 }
 0x199   : > { %v1624_v46 = vrot.slane %v1501_v57, 7  ;;  %v3909_v53 = vsel %vm3060_vm4, %v3345_v61, %v3337_v43  ;;  %v1734_v25 = vmul.f32 %v3383_v47, %v1638_v30  ;;  %v1626_v23 = vrot.slane %v3514_v6, 7 }
 0x19a   : > { %v1710_v10 = vmul.f32 %v3909_v53, %v1499_v19  ;;  %v3910_v29 = vsel %vm3177_vm6, %v3362_v18, %v3356_v34  ;;  %v3555_v21 = vadd.f32 %v1733_v44, %v1709_v28  ;;  %v1612_v31 = vsel %vm1569_vm2, %v1608_v60, %v1610_v56  ;;  %v3911_v44 = vld [vmem:[#allocation11_spill] sm:$0xff] }
 0x19b   : > { %v1712_v62 = vmul.f32 %v3910_v29, %v1501_v57  ;;  %v1618_v11 = vsel %vm1569_vm2, %v1610_v56, %v1604_v24  ;;  %v1630_v43 = vsel %vm1586_vm3, %v1622_v13, %v1624_v46  ;;  %v1628_v61 = vsel %vm1586_vm3, %v1624_v46, %v1626_v23 }
 0x19c   : > { %v3563_v30 = vadd.f32 %v1734_v25, %v1710_v10  ;;  %v1640_v34 = vsel %vm3177_vm6, %v1612_v31, %v1630_v43  ;;  %v1603_v18 = vrot.slane %v1496_v35, 1  ;;  %v1801_v47 = vmul.f32 %v3555_v21, %v3911_v44  ;;  %v3920_v31 = vld [vmem:[#allocation18_spill] sm:$0xff]  ;;  %v3921_v43 = vld [vmem:[#allocation15_spill] sm:$0xff] }
 0x19d   : > { %v1642_v60 = vsel %vm3199_vm7, %v1618_v11, %v1628_v61  ;;  %v3912_v25 = vsel %vm3199_vm7, %v3375_v48, %v3378_v20  ;;  %v1736_v57 = vmul.f32 %v3437_v38, %v1640_v34  ;;  %v1623_v26 = vrot.slane %v1500_v45, 7 }
 0x19e   : > { %v1714_v49 = vmul.f32 %v3912_v25, %v3514_v6  ;;  %v1738_v46 = vmul.f32 %v3467_v22, %v1642_v60  ;;  %v1615_v19 = vsel %vm1569_vm2, %v1603_v18, %v1605_v4  ;;  %v1617_v13 = vsel %vm1569_vm2, %v1609_v42, %v1603_v18 }
 0x19f   : > { %v3585_v63 = vadd.f32 %v1736_v57, %v1712_v62  ;;  %v1635_v28 = vsel %vm3124_vm5, %v1615_v19, %v1633_v14  ;;  %v1959_v56 = vrot.slane %v3500_v40, 4  ;;  %v1950_v48 = vrot.slane %v3519_v54, 4 }
 0x1a0   : > { %v3591_v20 = vadd.f32 %v1738_v46, %v1714_v49  ;;  %v1627_v38 = vsel %vm1586_vm3, %v1623_v26, %v1625_v2  ;;  %v1629_v22 = vsel %vm1586_vm3, %v1621_v1, %v1623_v26  ;;  %v3913_v42 = vsel %vm3124_vm5, %v3440_v41, %v3406_v17 }
 0x1a1   : > { %v1707_v6 = vmul.f32 %v3913_v42, %v1496_v35  ;;  %v1639_v4 = vsel %vm3177_vm6, %v1611_v12, %v1629_v22  ;;  %v1641_v14 = vsel %vm3199_vm7, %v1617_v13, %v1627_v38  ;;  %v1731_v53 = vmul.f32 %v3488_v55, %v1635_v28 }
 0x1a2   : > { %v1616_v2 = vsel %vm1569_vm2, %v1604_v24, %v1606_v59  ;;  %v3914_v1 = vsel %vm3177_vm6, %v3448_v50, %v3417_v36  ;;  %v3915_v41 = vsel %vm3199_vm7, %v3451_v16, %v3420_v51  ;;  %v1735_v35 = vmul.f32 %v3493_v37, %v1639_v4 }
 0x1a3   : > { %v1711_v10 = vmul.f32 %v3914_v1, %v1500_v45  ;;  %v1713_v17 = vmul.f32 %v3915_v41, %v1502_v27  ;;  %v1737_v12 = vmul.f32 %v3498_v15, %v1641_v14  ;;  %v1749_v55 = vmul.f32 %v3555_v21, %v3555_v21  ;;  %v3917_v15 = vld [vmem:[#allocation10_spill] sm:$0xff]  ;;  %v3918_v27 = vld [vmem:[#allocation17_spill] sm:$0xff] }
 0x1a4   : > { %v3623_v59 = vadd.f32 %v1731_v53, %v1707_v6  ;;  %v1634_v32 = vsel %vm1586_vm3, %v1626_v23, %v1620_v9  ;;  %v1960_v36 = vadd.f32 %v1959_v56, %v3500_v40  ;;  %v3916_v51 = vsel %vm3124_vm5, %v3365_v52, %v3353_v5  ;;  %v3919_v23 = vld [vmem:[#allocation12_spill] sm:$0xff]  ;;  %v3923_v56 = vld [vmem:[#allocation19_spill] sm:$0xff] }
 0x1a5   : > { %v3628_v50 = vadd.f32 %v1735_v35, %v1711_v10  ;;  %v3630_v33 = vadd.f32 %v1737_v12, %v1713_v17  ;;  %v1636_v16 = vsel %vm3124_vm5, %v1616_v2, %v1634_v32  ;;  %v1708_v37 = vmul.f32 %v3916_v51, %v3506_v3 }
 0x1a6   : > { %v1747_v0 = vmul.f32 %v3623_v59, %v3623_v59  ;;  %v1799_v40 = vmul.f32 %v3623_v59, %v3917_v15  ;;  %v1732_v45 = vmul.f32 %v3445_v58, %v1636_v16  ;;  %v1802_v9 = vmul.f32 %v3563_v30, %v3918_v27 }
 0x1a7   : > { %v1751_v24 = vmul.f32 %v3628_v50, %v3628_v50  ;;  %v1803_v8 = vmul.f32 %v3628_v50, %v3919_v23  ;;  %v1750_v5 = vmul.f32 %v3563_v30, %v3563_v30  ;;  %v1951_v52 = vadd.f32 %v1950_v48, %v3519_v54  ;;  %v3922_v54 = vld [vmem:[#allocation20_spill] sm:$0xff] }
 0x1a8   : > { %v1755_v3 = vadd.f32 %v1749_v55, %v1747_v0  ;;  %v1807_v29 = vadd.f32 %v1801_v47, %v1799_v40  ;;  %v3654_v62 = vadd.f32 %v1732_v45, %v1708_v37  ;;  %v1804_v58 = vmul.f32 %v3585_v63, %v3920_v31 }
 0x1a9   : > { %v1753_v11 = vmul.f32 %v3630_v33, %v3630_v33  ;;  %v1805_v61 = vmul.f32 %v3630_v33, %v3921_v43  ;;  %v1961_v34 = vrot.slane %v1960_v36, 2  ;;  %v1752_v49 = vmul.f32 %v3585_v63, %v3585_v63 }
 0x1aa   : > { %v1756_v18 = vadd.f32 %v1755_v3, %v1751_v24  ;;  %v1808_v60 = vadd.f32 %v1807_v29, %v1803_v8  ;;  %v1748_v25 = vmul.f32 %v3654_v62, %v3654_v62  ;;  %v1800_v47 = vmul.f32 %v3654_v62, %v3922_v54 }
 0x1ab   : > { %v1952_v57 = vrot.slane %v1951_v52, 2  ;;  %v1754_v28 = vmul.f32 %v3591_v20, %v3591_v20  ;;  %v1806_v48 = vmul.f32 %v3591_v20, %v3923_v56  ;;  %v1962_v38 = vadd.f32 %v1961_v34, %v1960_v36 }
 0x1ac   : > { %v1757_v46 = vadd.f32 %v1756_v18, %v1753_v11  ;;  %v1809_v19 = vadd.f32 %v1808_v60, %v1805_v61  ;;  %v1764_v13 = vadd.f32 %v1750_v5, %v1748_v25  ;;  %v1816_v26 = vadd.f32 %v1802_v9, %v1800_v47  ;;  %v3924_v25 = vld [vmem:[#allocation21_spill] sm:$0xff] }
 0x1ad   : > { %v1953_v14 = vadd.f32 %v1952_v57, %v1951_v52  ;;  %v1963_v41 = vrot.slane %v1962_v38, 1  ;;  %v3925_v47 = vcombine.low %v3304_v7, %v3924_v25 }
 0x1ae   : > { %v1758_v22 = vrot.slane %v1757_v46, 4  ;;  %v1810_v42 = vrot.slane %v1809_v19, 4  ;;  %v1765_v6 = vadd.f32 %v1764_v13, %v1752_v49  ;;  %v1817_v4 = vadd.f32 %v1816_v26, %v1804_v58 }
 0x1af   : > { %v1954_v32 = vrot.slane %v1953_v14, 1  ;;  %v1964_v36 = vadd.f32 %v1963_v41, %v1962_v38  ;;  %v1873_v49 = vrot.slane %v3925_v47, %v3904_v39 }
 0x1b0   : > { %v1759_v53 = vadd.f32 %v1758_v22, %v1757_v46  ;;  %v1811_v2 = vadd.f32 %v1810_v42, %v1809_v19  ;;  %v1766_v1 = vadd.f32 %v1765_v6, %v1754_v28  ;;  %v1818_v10 = vadd.f32 %v1817_v4, %v1806_v48  ;;  %v3926_v48 = vld [vmem:[#allocation14_spill] sm:$0xff]  ;;  %v3927_v22 = vld [vmem:[#allocation13_spill] sm:$0xff] }
 0x1b1   : > { %v1955_v8 = vadd.f32 %v1954_v32, %v1953_v14  ;;  %2411 = vrsqrt.f32 %v1964_v36  ;;  %v1880_v26 = vrot.slane %v1873_v49, %v3904_v39  ;;  %v3685_v14 = vld [vmem:[%s2732_s16] sm:$0x3]  ;;  %vm1974_vm10 = vcmp.eq.f32.partialorder %v1964_v36, inf  ;;  %s3752_s16 = scalar_lea.sflag [#allocation3], %s444_s15 }
 0x1b2   : > { %v1760_v17 = vrot.slane %v1759_v53, 2  ;;  %v1812_v35 = vrot.slane %v1811_v2, 2  ;;  %v1767_v12 = vrot.slane %v1766_v1, 4  ;;  %v1819_v55 = vrot.slane %v1818_v10, 4 }
 0x1b3   : > { %2413 = vrsqrt.f32 %v1955_v8  ;;  %vm1967_vm11 = vcmp.eq.f32.partialorder %v1955_v8, inf  ;;  %vm1976_vm12 = vcmp.eq.f32.partialorder %v1964_v36, 0.0  ;;  %vm1969_vm13 = vcmp.eq.f32.partialorder %v1955_v8, 0.0 }
 0x1b4   : > { %v1761_v16 = vadd.f32 %v1760_v17, %v1759_v53  ;;  %v1813_v51 = vadd.f32 %v1812_v35, %v1811_v2  ;;  %v1768_v37 = vadd.f32 %v1767_v12, %v1766_v1  ;;  %v1820_v0 = vadd.f32 %v1819_v55, %v1818_v10 }
 0x1b5   : > { %v1887_v53 = vmul.f32 %v3685_v14, %v1880_v26  ;;  %v1977_v35 = vand.u32 2147483648, %v1964_v36  ;;  %v1970_v12 = vand.u32 2147483648, %v1955_v8 }
 0x1b6   : > { %v1762_v40 = vrot.slane %v1761_v16, 1  ;;  %v1814_v45 = vrot.slane %v1813_v51, 1  ;;  %v1769_v9 = vrot.slane %v1768_v37, 2  ;;  %v1821_v24 = vrot.slane %v1820_v0, 2 }
 0x1b8   : > { %v1770_v5 = vadd.f32 %v1769_v9, %v1768_v37  ;;  %v1822_v52 = vadd.f32 %v1821_v24, %v1820_v0  ;;  %v1763_v3 = vadd.f32 %v1762_v40, %v1761_v16  ;;  %v1815_v29 = vadd.f32 %v1814_v45, %v1813_v51 }
 0x1ba   : > { %v1771_v58 = vrot.slane %v1770_v5, 1  ;;  %v1823_v11 = vrot.slane %v1822_v52, 1 }
 0x1bb   : > { %v2412_v28 = vpop.eup %2411 }
 0x1bc   : > { %v1772_v61 = vadd.f32 %v1771_v58, %v1770_v5  ;;  %v1824_v34 = vadd.f32 %v1823_v11, %v1822_v52  ;;  %v1973_v10 = vmul.f32 %v2412_v28, %v1964_v36  ;;  %v3928_v52 = vld [vmem:[#allocation9_spill] sm:$0xff]  ;;  %v3930_v28 = vld [vmem:[#allocation22_spill] sm:$0xff] }
 0x1bd   : > { %v2414_v6 = vpop.eup %2413 }
 0x1be   : > { %v1827_v18 = vcombine.low %v1815_v29, %v1824_v34  ;;  %v1847_v60 = vcombine.low %v1763_v3, %v1772_v61  ;;  %v1966_v41 = vmul.f32 %v2414_v6, %v1955_v8  ;;  %v1975_v55 = vsel %vm1974_vm10, %v1964_v36, %v1973_v10  ;;  %v3932_v6 = vld [vmem:[#allocation24_spill] sm:$0xff] }
 0x1bf   : > { %v3688_v16 = vsel %vm1976_vm12, %v1977_v35, %v1975_v55  ;;  %v3934_v35 = vld [vmem:[#allocation26_spill] sm:$0xff] }
 0x1c0   : > { %v1834_v57 = vrot.slane %v1827_v18, %v3904_v39  ;;  %v1854_v46 = vrot.slane %v1847_v60, %v3904_v39  ;;  %v1968_v32 = vsel %vm1967_vm11, %v1955_v8, %v1966_v41  ;;  %v3929_v8 = vld [vmem:[#allocation8_spill] sm:$0xff] }
 0x1c1   : > { %v3690_v51 = vsel %vm1969_vm13, %v1970_v12, %v1968_v32 }
 0x1c2   : > { %v1841_v19 = vrot.slane %v1834_v57, %v3904_v39  ;;  %v1861_v13 = vrot.slane %v1854_v46, %v3904_v39  ;;  %v2011_v0 = vcombine.low %v3690_v51, %v3688_v16 }
 0x1c4   : > { %v1843_v38 = vmul.f32 %v1841_v19, %v3926_v48  ;;  %v1863_v42 = vmul.f32 %v1861_v13, %v3927_v22  ;;  %v1890_v37 = vmul.f32 %v3685_v14, %v1861_v13  ;;  %v2018_v9 = vrot.slane %v2011_v0, %v3904_v39 }
 0x1c6   : > { %v1844_v4 = vadd.f32 1.0, %v1843_v38  ;;  %v1882_v7 = vmul.f32 %v1880_v26, %v1863_v42  ;;  %v1891_v40 = vsub.f32 1.0, %v1890_v37  ;;  %v2025_v11 = vrot.slane %v2018_v9, %v3904_v39  ;;  %v3931_v42 = vld [vmem:[#allocation23_spill] sm:$0xff]  ;;  %v3935_v37 = vld [vmem:[#allocation16_spill] sm:$0xff] }
 0x1c8   : > { %v1883_v2 = vadd.f32 %v1882_v7, %v1844_v4  ;;  %v1888_v1 = vadd.f32 %v1887_v53, %v1844_v4  ;;  %v3933_v53 = vld [vmem:[#allocation25_spill] sm:$0xff] }
 0x1ca   : > { %v1884_v17 = vmax.f32 %v1883_v2, 1e-15 }
 0x1cc   : > { %2415 = vrcp.f32 %v1884_v17 }
 0x1cd   : > { %2417 = vrcp.f32 %v3688_v16 }
 0x1d6   : > { %v2416_v45 = vpop.eup %2415 }
 0x1d7   : > { %v1889_v24 = vmul.f32 %v2416_v45, %v1888_v1  ;;  %v1892_v5 = vmul.f32 %v2416_v45, %v1891_v40 }
 0x1d9   : > { %v1901_v3 = vrot.slane %v1889_v24, %v3928_v52  ;;  %v1920_v36 = vrot.slane %v1892_v5, %v3928_v52  ;;  %v1897_v29 = vrot.slane %v1889_v24, %v3929_v8  ;;  %v1916_v58 = vrot.slane %v1892_v5, %v3929_v8 }
 0x1db   : > { %v1905_v61 = vmul.f32 %v1901_v3, %v3654_v62  ;;  %v1924_v34 = vmul.f32 %v1920_v36, %v3922_v54  ;;  %v1904_v18 = vmul.f32 %v1897_v29, %v3623_v59  ;;  %v1923_v60 = vmul.f32 %v1916_v58, %v3917_v15 }
 0x1dc   : > { %v1907_v25 = vmul.f32 %v1901_v3, %v3563_v30  ;;  %v1926_v47 = vmul.f32 %v1920_v36, %v3918_v27  ;;  %v1906_v49 = vmul.f32 %v1897_v29, %v3555_v21  ;;  %v1925_v57 = vmul.f32 %v1916_v58, %v3911_v44 }
 0x1dd   : > { %v1932_v46 = vadd.f32 %v1924_v34, %v1905_v61  ;;  %v1931_v19 = vadd.f32 %v1923_v60, %v1904_v18  ;;  %v1909_v13 = vmul.f32 %v1901_v3, %v3585_v63  ;;  %v1928_v62 = vmul.f32 %v1920_v36, %v3920_v31  ;;  %v3937_v61 = vld [vmem:[#allocation6_spill] sm:$0xff] }
 0x1de   : > { %v1934_v26 = vadd.f32 %v1926_v47, %v1907_v25  ;;  %v1933_v54 = vadd.f32 %v1925_v57, %v1906_v49  ;;  %v1908_v59 = vmul.f32 %v1897_v29, %v3628_v50  ;;  %v1927_v15 = vmul.f32 %v1916_v58, %v3919_v23  ;;  %v3938_v47 = vld [vmem:[#allocation27_spill] sm:$0xff] }
 0x1df   : > { %v1980_v30 = vmul.f32 %v1932_v46, %v3930_v28  ;;  %v2031_v38 = vmul.f32 %v1932_v46, %v1932_v46  ;;  %v2030_v27 = vmul.f32 %v1931_v19, %v1931_v19  ;;  %v1979_v21 = vmul.f32 %v1931_v19, %v3931_v42 }
 0x1e0   : > { %v1982_v44 = vmul.f32 %v1934_v26, %v3932_v6  ;;  %v2033_v4 = vmul.f32 %v1934_v26, %v1934_v26  ;;  %v2032_v7 = vmul.f32 %v1933_v54, %v1933_v54  ;;  %v1981_v63 = vmul.f32 %v1933_v54, %v3933_v53 }
 0x1e1   : > { %v1936_v2 = vadd.f32 %v1928_v62, %v1909_v13  ;;  %v1935_v31 = vadd.f32 %v1927_v15, %v1908_v59  ;;  %v1911_v1 = vmul.f32 %v1901_v3, %v3591_v20  ;;  %v1930_v50 = vmul.f32 %v1920_v36, %v3923_v56  ;;  %v3936_v56 = vld [vmem:[#allocation5_spill] sm:$0xff] }
 0x1e2   : > { %v1996_v10 = vadd.f32 %v1982_v44, %v1980_v30  ;;  %v2047_v23 = vadd.f32 %v2033_v4, %v2031_v38  ;;  %v2038_v41 = vadd.f32 %v2032_v7, %v2030_v27  ;;  %v1987_v17 = vadd.f32 %v1981_v63, %v1979_v21  ;;  %v2418_v21 = vpop.eup %2417 }
 0x1e3   : > { %v1984_v12 = vmul.f32 %v1936_v2, %v3934_v35  ;;  %v2035_v55 = vmul.f32 %v1936_v2, %v1936_v2  ;;  %v2034_v32 = vmul.f32 %v1935_v31, %v1935_v31  ;;  %v1983_v0 = vmul.f32 %v1935_v31, %v3935_v37 }
 0x1e4   : > { %v1938_v40 = vadd.f32 %v1930_v50, %v1911_v1  ;;  %v1910_v45 = vmul.f32 %v1897_v29, %v3630_v33  ;;  %v1929_v9 = vmul.f32 %v1916_v58, %v3921_v43  ;;  %v2027_v34 = vmul.f32 %v2025_v11, %v3937_v61 }
 0x1e5   : > { %v1997_v24 = vadd.f32 %v1996_v10, %v1984_v12  ;;  %v2048_v5 = vadd.f32 %v2047_v23, %v2035_v55  ;;  %v2039_v20 = vadd.f32 %v2038_v41, %v2034_v32  ;;  %v1988_v52 = vadd.f32 %v1987_v17, %v1983_v0  ;;  %v3939_v10 = vld [vmem:[#allocation7_spill] sm:$0xff] }
 0x1e6   : > { %v1986_v3 = vmul.f32 %v1938_v40, %v3936_v56  ;;  %v2037_v36 = vmul.f32 %v1938_v40, %v1938_v40  ;;  %v1937_v8 = vadd.f32 %v1929_v9, %v1910_v45  ;;  %2419 = vtanh.f32 %v2027_v34 }
 0x1e7   : > { %2421 = vrcp.f32 %v3690_v51 }
 0x1e8   : > { %v1998_v18 = vadd.f32 %v1997_v24, %v1986_v3  ;;  %v2049_v60 = vadd.f32 %v2048_v5, %v2037_v36  ;;  %v2036_v25 = vmul.f32 %v1937_v8, %v1937_v8  ;;  %v1985_v49 = vmul.f32 %v1937_v8, %v3938_v47 }
 0x1ea   : > { %v1999_v33 = vrot.slane %v1998_v18, 4  ;;  %v2050_v29 = vrot.slane %v2049_v60, 4  ;;  %v2040_v43 = vadd.f32 %v2039_v20, %v2036_v25  ;;  %v1989_v58 = vadd.f32 %v1988_v52, %v1985_v49 }
 0x1ec   : > { %v2000_v57 = vadd.f32 %v1999_v33, %v1998_v18  ;;  %v2051_v46 = vadd.f32 %v2050_v29, %v2049_v60  ;;  %v2041_v19 = vrot.slane %v2040_v43, 4  ;;  %v1990_v13 = vrot.slane %v1989_v58, 4 }
 0x1ee   : > { %v2001_v62 = vrot.slane %v2000_v57, 2  ;;  %v2052_v11 = vrot.slane %v2051_v46, 2  ;;  %v2042_v26 = vadd.f32 %v2041_v19, %v2040_v43  ;;  %v1991_v54 = vadd.f32 %v1990_v13, %v1989_v58 }
 0x1f0   : > { %v2002_v59 = vadd.f32 %v2001_v62, %v2000_v57  ;;  %v2053_v15 = vadd.f32 %v2052_v11, %v2051_v46  ;;  %v2043_v28 = vrot.slane %v2042_v26, 2  ;;  %v1992_v30 = vrot.slane %v1991_v54, 2  ;;  %v2420_v53 = vpop.eup %2419 }
 0x1f1   : > { %v2422_v31 = vpop.eup %2421  ;;  %v2029_v23 = vmul.f32 %v2420_v53, %v3939_v10  ;;  %v2123_v53 = vmul.f32 2.0, %v3939_v10 }
 0x1f2   : > { %v2003_v16 = vrot.slane %v2002_v59, 1  ;;  %v2054_v38 = vrot.slane %v2053_v15, 1  ;;  %v2044_v27 = vadd.f32 %v2043_v28, %v2042_v26  ;;  %v1993_v42 = vadd.f32 %v1992_v30, %v1991_v54 }
 0x1f3   : > { %v2118_v55 = vmul.f32 %v2029_v23, %v3927_v22  ;;  %v2056_v37 = vmul.f32 %v2029_v23, %v3926_v48  ;;  %v2077_v40 = vmul.f32 %v3685_v14, %v2029_v23 }
 0x1f4   : > { %v2004_v6 = vadd.f32 %v2003_v16, %v2002_v59  ;;  %v2055_v44 = vadd.f32 %v2054_v38, %v2053_v15  ;;  %v2045_v4 = vrot.slane %v2044_v27, 1  ;;  %v1994_v7 = vrot.slane %v1993_v42, 1 }
 0x1f5   : > { %v2119_v24 = vmul.f32 %v2118_v55, %v2029_v23  ;;  %v2078_v52 = vmul.f32 %v2077_v40, %v2029_v23 }
 0x1f6   : > { %v2008_v63 = vmul.f32 %v2418_v21, %v2004_v6  ;;  %v2046_v51 = vadd.f32 %v2045_v4, %v2044_v27  ;;  %v1995_v2 = vadd.f32 %v1994_v7, %v1993_v42 }
 0x1f8   : > { %v2082_v1 = vcombine.low %v2046_v51, %v2055_v44  ;;  %v2006_v50 = vmul.f32 %v2422_v31, %v1995_v2  ;;  %v2151_v51 = vld [vmem:[%s523_s22] sm:$0x3] }
 0x1f9   : > { %v2152_v2 = vld [vmem:[%s536_s9] sm:$0x3] }
 0x1fa   : > { %v2089_v41 = vrot.slane %v2082_v1, %v3904_v39  ;;  %v2059_v17 = vcombine.low %v2006_v50, %v2008_v63  ;;  %v2153_v1 = vadd.f32 %v2152_v2, %v2151_v51 }
 0x1fc   : > { %v2096_v35 = vrot.slane %v2089_v41, %v3904_v39  ;;  %v2066_v12 = vrot.slane %v2059_v17, %v3904_v39  ;;  %v3940_v41 = vlaneseq }
 0x1fe   : > { %v2098_v32 = vmul.f32 %v3685_v14, %v2096_v35  ;;  %v2073_v0 = vrot.slane %v2066_v12, %v3904_v39  ;;  %v2120_v56 = vmul.f32 %v2119_v24, %v2096_v35  ;;  %vm2158_vm2 = vcmp.lt.s32.totalorder %v3940_v41, 256 }
 0x200   : > { %v2099_v45 = vsub.f32 1.0, %v2098_v32  ;;  %v2075_v9 = vmul.f32 %v2073_v0, %v2056_v37 }
 0x202   : > { %v2102_v5 = vmul.f32 %v2099_v45, %v2099_v45  ;;  %v2076_v20 = vsub.f32 1.0, %v2075_v9 }
 0x204   : > { %v2079_v3 = vadd.f32 %v2078_v52, %v2076_v20  ;;  %v2103_v36 = vmul.f32 %v2102_v5, %v2029_v23  ;;  %v2121_v8 = vadd.f32 %v2120_v56, %v2076_v20 }
 0x206   : > { %v2100_v34 = vmul.f32 %v2079_v3, %v2079_v3  ;;  %v2106_v22 = vmul.f32 2.0, %v2079_v3  ;;  %v2104_v60 = vmul.f32 %v2103_v36, %v2029_v23  ;;  %v2122_v14 = vmax.f32 %v2121_v8, 1e-15 }
 0x208   : > { %v2101_v18 = vmul.f32 %v2100_v34, %v2096_v35  ;;  %v2107_v25 = vmul.f32 %v2106_v22, %v2099_v45 }
 0x20a   : > { %v2105_v48 = vadd.f32 %v2104_v60, %v2101_v18  ;;  %v2108_v47 = vmul.f32 %v2107_v25, %v2029_v23 }
 0x20c   : > { %v2109_v39 = vmul.f32 %v2108_v47, %v2073_v0 }
 0x20e   : > { %v2110_v49 = vsub.f32 %v2105_v48, %v2109_v39 }
 0x210   : > { %2423 = vrsqrt.f32 %v2110_v49  ;;  %vm2113_vm14 = vcmp.eq.f32.partialorder %v2110_v49, inf  ;;  %v2116_v43 = vand.u32 2147483648, %v2110_v49  ;;  %vm2115_vm15 = vcmp.eq.f32.partialorder %v2110_v49, 0.0 }
 0x211   : > { %2425 = vrcp.f32 %v2122_v14 }
 0x21a   : > { %v2424_v33 = vpop.eup %2423 }
 0x21b   : > { %v2112_v29 = vmul.f32 %v2424_v33, %v2110_v49  ;;  %v2426_v19 = vpop.eup %2425 }
 0x21d   : > { %v2114_v58 = vsel %vm2113_vm14, %v2110_v49, %v2112_v29 }
 0x21e   : > { %v2117_v57 = vsel %vm2115_vm15, %v2116_v43, %v2114_v58 }
 0x21f   : > { %v2124_v46 = vmul.f32 %v2117_v57, %v3937_v61 }
 0x221   : > { %v2126_v13 = vmul.f32 %v2426_v19, %v2124_v46 }
 0x223   : > { %v2319_v62 = vclamps-f32 %v2126_v13, 0.99999 }
 0x225   : > { %v2129_v11 = vadd.f32 1.0, %v2319_v62  ;;  %v2138_v26 = vsub.f32 0.0, %v2319_v62  ;;  %v2132_v59 = vmul.f32 -0.5, %v2319_v62  ;;  %v2135_v38 = vand.u32 2147483647, %v2319_v62 }
 0x227   : > { %2427 = vlog2.f32 %v2129_v11  ;;  %v2139_v54 = vadd.f32 1.0, %v2138_v26  ;;  %v2142_v15 = vmul.f32 -0.5, %v2138_v26  ;;  %v2133_v28 = vadd.f32 1.0, %v2132_v59 }
 0x228   : > { %v2145_v27 = vand.u32 2147483647, %v2138_v26  ;;  %vm2136_vm0 = vcmp.lt.f32.partialorder %v2135_v38, 0.0004427343 }
 0x229   : > { %2429 = vlog2.f32 %v2139_v54  ;;  %v2143_v30 = vadd.f32 1.0, %v2142_v15  ;;  %v2134_v61 = vmul.f32 %v2319_v62, %v2133_v28 }
 0x22a   : > { %vm2146_vm1 = vcmp.lt.f32.partialorder %v2145_v27, 0.0004427343 }
 0x22b   : > { %v2144_v44 = vmul.f32 %v2143_v30, %v2138_v26 }
 0x231   : > { %v2428_v16 = vpop.eup %2427 }
 0x232   : > { %v2131_v42 = vmul.f32 0.6931472, %v2428_v16 }
 0x233   : > { %v2430_v21 = vpop.eup %2429 }
 0x234   : > { %v2141_v6 = vmul.f32 0.6931472, %v2430_v21  ;;  %v2137_v4 = vsel %vm2136_vm0, %v2134_v61, %v2131_v42 }
 0x236   : > { %v2147_v7 = vsel %vm2146_vm1, %v2144_v44, %v2141_v6 }
 0x237   : > { %v2148_v63 = vsub.f32 %v2137_v4, %v2147_v7 }
 0x239   : > { %v2149_v31 = vmul.f32 0.5, %v2148_v63 }
 0x23b   : > { %v2150_v50 = vmul.f32 %v2149_v31, %v2123_v53  ;;  %2168 = sbr.rel (!%p2576_p5) target bundleno = 605 (0x25d), region = 52 }
 0x23d   : > { %v2154_v23 = vmul.f32 %v2150_v50, %v2150_v50 }
 0x23f   : > { %v2155_v17 = vsub.f32 %v2153_v1, %v2154_v23 }
 0x241   : > { %2160 = vst.msk [vmem:[%s446_s28] sm:$0x3] %vm2158_vm2, %v2155_v17 }
 0x242   : > { %s3946_s17 = smov (!%p2171_p12, %s2170_s17), 2 }
 0x243   : > { %s3757_s18 = sshll.u32 %s3946_s17, 4 }
 0x244   : > { %s2175_s19 = ssub.s32 32, %s3757_s18 }
 0x245   : > { %2176 = vsyncadd %s3752_s16, %s2175_s19  ;;  %p2323_p13 = scmp.ne.s32.totalorder %s3757_s18, 0  ;;  %s3766_s11 = scalar_lea.hbm %s3813_s7, %s2587_s13 }
 0x246   : > { %s2181_s21 = sshll.u32 %s446_s28, 4  ;;  %s2497_s22 = smov [#allocation2]   ;;  %s2182_s21 = int_to_ptr.vmem [resolvable:$true] %s2181_s21 }
 0x247   : > { %s2432_s8 = scalar_lea.vmem %s2182_s21, %s3757_s18  ;;  %s2436_s23 = sshll.u32 %s2497_s22, 4  ;;  %s2437_s23 = int_to_ptr.vmem [resolvable:$false] %s2436_s23 }
 0x248   : > { %p2433_p0 = scmp.ne.s32.totalorder %s2182_s21, %s2432_s8  ;;  %s2438_s29 = scalar_lea.vmem %s2437_s23, 64 }
 0x249   : > { %p2439_p3 = scmp.lt.s32.totalorder %s2182_s21, %s2437_s23  ;;  %p2440_p4 = scmp.lt.s32.totalorder %s2438_s29, %s2432_s8 }
 0x24a   : > { %p2434_p1 = pnand %p2433_p0, %p2323_p13 }
 0x24b   : > { %p2441_p5 = por %p2440_p4, %p2439_p3 }
 0x24c   : > { %p2435_p2 = pneg %p2434_p1 }
 0x24e   : > { %p2442_p7 = pnand %p2441_p5, %p2435_p2 }
 0x250   : > { %2445 = shalt.err (!%p2442_p7)
}
 0x251   : > { %s2446_s13 = scalar_lea.hbm %s3766_s11, %s3757_s18  ;;  %s2450_s28 = scalar_lea.hbm %s3813_s7, 48 }
 0x252   : > { %p2447_p8 = scmp.ne.s32.totalorder %s3766_s11, %s2446_s13  ;;  %p2451_p11 = scmp.lt.u32.totalorder %s3766_s11, %s3813_s7 }
 0x253   : > { %p2452_p12 = scmp.lt.u32.totalorder %s2450_s28, %s2446_s13  ;;  %p2454_p1 = scmp.lt.u32.totalorder %s2446_s13, %s3766_s11 }
 0x254   : > { %p2448_p9 = pnand %p2447_p8, %p2323_p13 }
 0x255   : > { %p2453_p0 = por %p2452_p12, %p2451_p11 }
 0x256   : > { %p2449_p10 = pneg %p2448_p9 }
 0x257   : > { %p2455_p2 = por %p2454_p1, %p2453_p0 }
 0x259   : > { %p2456_p3 = pnand %p2455_p2, %p2449_p10 }
 0x25b   : > { %2459 = shalt.err (!%p2456_p3)
}
 0x25c   : > { %2184 = dma.vmem_to_hbm [thread:$0]  (%p2323_p13), %s2182_s21, %s3757_s18, %s3766_s11, %s3752_s16  }
 0x25d PF: > { %p2333_p4 = scmp.ge.s32.totalorder %s2494_s27, 2  ;;  %s2193_s15 = sand.u32 1, %s2482_s24  }
 0x25e   : > { %s2194_s20 = scalar_lea.sflag [#allocation3], %s2193_s15 }
 0x25f   : > { %p2330_p5 = pnand %p2333_p4, %p2580_p6 }
 0x261   : > { %2477 = dma.done.wait (!%p2330_p5), %s2194_s20, 32  }
 0x262   : > { %2479 = vsyncadd (!%p2330_p5), %s2194_s20, 4294967264  ;;  %p17_p7 = scmp.ge.s32.totalorder %s2563_s30, 4   ;;  %s3941_s24 = smov %s2486_s25 }
 0x263   : > { %s3942_s25 = smov %s2490_s26  ;;  %s3943_s26 = smov %s2574_s10 }
 0x264   : > { %s3944_s27 = smov %s2563_s30  ;;  %19 = sbr.rel (!%p17_p7) target bundleno = 3 (0x3), region = 101 }
 0x26b   :  { %2199 = vsyncpa [#allocation3], 1 }
 0x26c   :  { %2201 = vsyncpa [#allocation3 + $0x1], 1 }

</bundles_post_ra>
